<compile_context>
chip_gen: v6e
topology: v6e:2x2x1
jax: 0.10.0
libtpu: 0.0.40
codegen_flags: <defaults>
</compile_context>

<pallas_src>
import jax
import jax.numpy as jnp
from jax.experimental import pallas as pl
from jax.experimental.pallas import tpu as pltpu

# ----------------------------- model config ---------------------------------
B = 2            # batch
S = 8            # sequence length
H = 32           # bert hidden size
N_HEADS = 2
D_HEAD = H // N_HEADS
FFN = 64         # intermediate size
N_LAYERS = 2
OUT_SIZE = 32    # config.encoder_output_size
VOCAB = 30522 + 4   # config.vocab_size + config.marker_size (resize_token_embeddings)
E11_ID = 30522
E21_ID = 30524
LN_EPS = 1e-12
ATTN_SCALE = 1.0 / float(D_HEAD) ** 0.5


# ----------------------------- shared math -----------------------------------
def _layernorm(y, g, b, eps=LN_EPS):
    mu = jnp.mean(y, axis=-1, keepdims=True)
    var = jnp.mean(jnp.square(y - mu), axis=-1, keepdims=True)
    return (y - mu) * jax.lax.rsqrt(var + eps) * g + b


def _gelu_tanh(x):
    # TODO(synk): HF BERT 'gelu' is the exact erf form; tanh approximation used
    # here for a Mosaic-safe EUP lowering (differs at ~1e-3 level).
    c = 0.7978845608028654  # sqrt(2/pi)
    return 0.5 * x * (1.0 + jnp.tanh(c * (x + 0.044715 * x * x * x)))


# ----------------------------- fused encoder kernel --------------------------
def _encoder_kernel(
    e11_ref, e21_ref,            # scalar prefetch (SMEM): flat row indices [B]
    emb_ref, eg_ref, eb_ref,     # summed embeddings (pre-LN) + embedding LN params
    wqkv_ref, bqkv_ref,          # fused QKV weights, current layer block
    wo_ref, bo_ref,
    l1g_ref, l1b_ref,
    w1_ref, b1_ref, w2_ref, b2_ref,
    l2g_ref, l2b_ref,
    ltw_ref, ltb_ref,            # final linear_transform
    out_ref,                     # [B, OUT_SIZE]
    x_sc,                        # VMEM scratch: resident activations [B*S, H]
):
    layer = pl.program_id(0)

    # ---- embedding LayerNorm (once; x becomes VMEM-resident) ---------------
    @pl.when(layer == 0)
    def _():
        x_sc[...] = _layernorm(emb_ref[...], eg_ref[...], eb_ref[...])

    x = x_sc[...]                                                    # [B*S, H]

    # ---- self attention: fused QKV projection -------------------------------
    qkv = (jnp.dot(x, wqkv_ref[0], preferred_element_type=jnp.float32)
           + bqkv_ref[0])                                            # [B*S, 3H]

    ctx_rows = []
    for b in range(B):                       # static unroll (B, N_HEADS tiny)
        rows = slice(b * S, (b + 1) * S)
        qkv_b = qkv[rows, :]                                         # [S, 3H]
        head_outs = []
        for h in range(N_HEADS):
            q_cols = slice(h * D_HEAD, (h + 1) * D_HEAD)
            k_cols = slice(H + h * D_HEAD, H + (h + 1) * D_HEAD)
            v_cols = slice(2 * H + h * D_HEAD, 2 * H + (h + 1) * D_HEAD)
            qh = qkv_b[:, q_cols] * ATTN_SCALE                       # [S, dH]
            kh = qkv_b[:, k_cols]                                    # [S, dH]
            vh = qkv_b[:, v_cols]                                    # [S, dH]
            s = jax.lax.dot_general(
                qh, kh, (((1,), (1,)), ((), ())),
                preferred_element_type=jnp.float32)                  # [S, S]
            m = jnp.max(s, axis=-1, keepdims=True)
            p = jnp.exp(s - m)
            denom = jnp.sum(p, axis=-1, keepdims=True)
            p = p * pl.reciprocal(denom, approx=True)
            head_outs.append(
                jnp.dot(p, vh, preferred_element_type=jnp.float32))  # [S, dH]
        ctx_rows.append(jnp.concatenate(head_outs, axis=1))          # [S, H]
    ctx = jnp.concatenate(ctx_rows, axis=0)                          # [B*S, H]

    attn_out = (jnp.dot(ctx, wo_ref[0],
                        preferred_element_type=jnp.float32) + bo_ref[0])
    x1 = _layernorm(attn_out + x, l1g_ref[0], l1b_ref[0])

    # ---- FFN with fused GELU + residual + LayerNorm -------------------------
    hdn = _gelu_tanh(jnp.dot(x1, w1_ref[0],
                             preferred_element_type=jnp.float32) + b1_ref[0])
    ffn = jnp.dot(hdn, w2_ref[0],
                  preferred_element_type=jnp.float32) + b2_ref[0]
    x_sc[...] = _layernorm(ffn + x1, l2g_ref[0], l2b_ref[0])

    # ---- last layer: entity-marker gather + linear_transform, all in VMEM ---
    @pl.when(layer == pl.num_programs(0) - 1)
    def _():
        x_final = x_sc[...]                                          # [B*S, H]
        # One-hot selection rows built from iota vs prefetched marker indices
        # (avoids dynamic-start VMEM indexing; gather becomes two MXU matmuls).
        row_iota = jax.lax.broadcasted_iota(jnp.int32, (1, B * S), 1)
        sel11_rows = []
        sel21_rows = []
        for b in range(B):
            sel11_rows.append((row_iota == e11_ref[b]).astype(jnp.float32))
            sel21_rows.append((row_iota == e21_ref[b]).astype(jnp.float32))
        sel11 = jnp.concatenate(sel11_rows, axis=0)                  # [B, B*S]
        sel21 = jnp.concatenate(sel21_rows, axis=0)                  # [B, B*S]
        feat11 = jnp.dot(sel11, x_final,
                         preferred_element_type=jnp.float32)         # [B, H]
        feat21 = jnp.dot(sel21, x_final,
                         preferred_element_type=jnp.float32)         # [B, H]
        # linear_transform with lt_w split into halves (== concat then matmul).
        out_ref[...] = (
            jnp.dot(feat11, ltw_ref[0:H, :],
                    preferred_element_type=jnp.float32)
            + jnp.dot(feat21, ltw_ref[H:2 * H, :],
                      preferred_element_type=jnp.float32)
            + ltb_ref[...])


def _full_spec(shape):
    n = len(shape)
    return pl.BlockSpec(shape, lambda *args, n=n: (0,) * n)


def _layer_spec(shape):
    n = len(shape)
    return pl.BlockSpec((1,) + shape, lambda l, *_, n=n: (l,) + (0,) * n)


@jax.jit
def bert_encoder_forward(params, input_ids):
    """Bert_Encoder.forward with pattern='entity_marker'. input_ids: [B, S] int32."""
    bsz, seq = input_ids.shape

    # Embedding lookup (glue): word + position + token-type, pre-LayerNorm.
    word = jnp.take(params["word_emb"], input_ids, axis=0)           # [B, S, H]
    emb = word + params["pos_emb"][None, :seq, :] + params["type_emb"][None, :, :]
    emb = emb.reshape(bsz * seq, H).astype(jnp.float32)

    # First occurrence of each marker per row (markers assumed present, as in
    # the reference); flatten to row indices of the [B*S, H] activation slab.
    e11 = jnp.argmax(input_ids == E11_ID, axis=1).astype(jnp.int32)
    e21 = jnp.argmax(input_ids == E21_ID, axis=1).astype(jnp.int32)
    base = (jnp.arange(bsz, dtype=jnp.int32) * seq)
    e11_flat = base + e11
    e21_flat = base + e21

    grid_spec = pltpu.PrefetchScalarGridSpec(
        num_scalar_prefetch=2,
        grid=(N_LAYERS,),
        in_specs=[
            _full_spec((bsz * seq, H)),        # emb (pre-LN)
            _full_spec((1, H)),                # emb_ln_g
            _full_spec((1, H)),                # emb_ln_b
            _layer_spec((H, 3 * H)),           # wqkv
            _layer_spec((1, 3 * H)),           # bqkv
            _layer_spec((H, H)),               # wo
            _layer_spec((1, H)),               # bo
            _layer_spec((1, H)),               # ln1_g
            _layer_spec((1, H)),               # ln1_b
            _layer_spec((H, FFN)),             # w1
            _layer_spec((1, FFN)),             # b1
            _layer_spec((FFN, H)),             # w2
            _layer_spec((1, H)),               # b2
            _layer_spec((1, H)),               # ln2_g
            _layer_spec((1, H)),               # ln2_b
            _full_spec((2 * H, OUT_SIZE)),     # lt_w
            _full_spec((1, OUT_SIZE)),         # lt_b
        ],
        out_specs=pl.BlockSpec((bsz, OUT_SIZE), lambda l, *_: (0, 0)),
        scratch_shapes=[
            pltpu.VMEM((bsz * seq, H), jnp.float32),   # x (resident activations)
        ],
    )

    return pl.pallas_call(
        _encoder_kernel,
        out_shape=jax.ShapeDtypeStruct((bsz, OUT_SIZE), jnp.float32),
        grid_spec=grid_spec,
        compiler_params=pltpu.CompilerParams(
            dimension_semantics=("arbitrary",)),
    )(
        e11_flat, e21_flat,
        emb,
        params["emb_ln_g"].reshape(1, H),
        params["emb_ln_b"].reshape(1, H),
        params["wqkv"], params["bqkv"],
        params["wo"], params["bo"],
        params["ln1_g"], params["ln1_b"],
        params["w1"], params["b1"], params["w2"], params["b2"],
        params["ln2_g"], params["ln2_b"],
        params["lt_w"], params["lt_b"].reshape(1, OUT_SIZE),
    )


# ----------------------------- pure-JAX reference -----------------------------
def bert_encoder_reference(params, input_ids):
    bsz, seq = input_ids.shape
    word = jnp.take(params["word_emb"], input_ids, axis=0)
    emb = word + params["pos_emb"][None, :seq, :] + params["type_emb"][None, :, :]
    x = _layernorm(emb.reshape(bsz * seq, H),
                   params["emb_ln_g"][None, :], params["emb_ln_b"][None, :])
    for l in range(N_LAYERS):
        qkv = x @ params["wqkv"][l] + params["bqkv"][l]
        q, k, v = qkv[:, :H], qkv[:, H:2 * H], qkv[:, 2 * H:]

        def heads(t):
            return t.reshape(bsz, seq, N_HEADS, D_HEAD).transpose(0, 2, 1, 3)

        s = jnp.einsum("bhqd,bhkd->bhqk", heads(q), heads(k)) * ATTN_SCALE
        p = jax.nn.softmax(s, axis=-1)
        ctx = jnp.einsum("bhqk,bhkd->bhqd", p, heads(v))
        ctx = ctx.transpose(0, 2, 1, 3).reshape(bsz * seq, H)
        attn_out = ctx @ params["wo"][l] + params["bo"][l]
        x1 = _layernorm(attn_out + x, params["ln1_g"][l], params["ln1_b"][l])
        hdn = _gelu_tanh(x1 @ params["w1"][l] + params["b1"][l])
        ffn = hdn @ params["w2"][l] + params["b2"][l]
        x = _layernorm(ffn + x1, params["ln2_g"][l], params["ln2_b"][l])
    tokens = x.reshape(bsz, seq, H)
    e11 = jnp.argmax(input_ids == E11_ID, axis=1)
    e21 = jnp.argmax(input_ids == E21_ID, axis=1)
    r = jnp.arange(bsz)
    feat = jnp.concatenate([tokens[r, e11], tokens[r, e21]], axis=-1)
    return feat @ params["lt_w"] + params["lt_b"][None, :]


# ----------------------------- parameter init --------------------------------
def init_params(key):
    def nrm(k, shape, std=0.02):
        return (jax.random.normal(k, shape, jnp.float32) * std).astype(jnp.float32)

    keys = iter(jax.random.split(key, 64))
    p = {}
    p["word_emb"] = nrm(next(keys), (VOCAB, H))
    p["pos_emb"] = nrm(next(keys), (S, H))
    p["type_emb"] = nrm(next(keys), (1, H))
    p["emb_ln_g"] = jnp.ones((H,), jnp.float32)
    p["emb_ln_b"] = jnp.zeros((H,), jnp.float32)

    wqkv, bqkv, wo, bo = [], [], [], []
    ln1g, ln1b, w1, b1, w2, b2, ln2g, ln2b = [], [], [], [], [], [], [], []
    for _ in range(N_LAYERS):
        wq = nrm(next(keys), (H, H))
        wk = nrm(next(keys), (H, H))
        wv = nrm(next(keys), (H, H))
        wqkv.append(jnp.concatenate([wq, wk, wv], axis=1))    # fused [H, 3H]
        bqkv.append(jnp.zeros((1, 3 * H), jnp.float32))
        wo.append(nrm(next(keys), (H, H)))
        bo.append(jnp.zeros((1, H), jnp.float32))
        ln1g.append(jnp.ones((1, H), jnp.float32))
        ln1b.append(jnp.zeros((1, H), jnp.float32))
        w1.append(nrm(next(keys), (H, FFN)))
        b1.append(jnp.zeros((1, FFN), jnp.float32))
        w2.append(nrm(next(keys), (FFN, H)))
        b2.append(jnp.zeros((1, H), jnp.float32))
        ln2g.append(jnp.ones((1, H), jnp.float32))
        ln2b.append(jnp.zeros((1, H), jnp.float32))

    p["wqkv"] = jnp.stack(wqkv)
    p["bqkv"] = jnp.stack(bqkv)
    p["wo"] = jnp.stack(wo)
    p["bo"] = jnp.stack(bo)
    p["ln1_g"] = jnp.stack(ln1g)
    p["ln1_b"] = jnp.stack(ln1b)
    p["w1"] = jnp.stack(w1)
    p["b1"] = jnp.stack(b1)
    p["w2"] = jnp.stack(w2)
    p["b2"] = jnp.stack(b2)
    p["ln2_g"] = jnp.stack(ln2g)
    p["ln2_b"] = jnp.stack(ln2b)

    p["lt_w"] = nrm(next(keys), (2 * H, OUT_SIZE))
    p["lt_b"] = jnp.zeros((OUT_SIZE,), jnp.float32)
    return p


# ----------------------------- main -------------------------------------------
if __name__ == "__main__":
    key = jax.random.PRNGKey(0)
    pkey, dkey = jax.random.split(key)
    params = init_params(pkey)

    # Deterministic token ids with entity markers planted.
    input_ids = jax.random.randint(dkey, (B, S), 0, 30522, dtype=jnp.int32)
    input_ids = input_ids.at[:, 2].set(E11_ID)   # [E1] marker -> id 30522
    input_ids = input_ids.at[:, 5].set(E21_ID)   # [E2] marker -> id 30524

    out = bert_encoder_forward(params, input_ids)
    out = jax.block_until_ready(out)

    assert out.shape == (B, OUT_SIZE), out.shape
    assert bool(jnp.all(jnp.isfinite(out)))

    ref = bert_encoder_reference(params, input_ids)
    max_err = float(jnp.max(jnp.abs(out - ref)))
    assert jnp.allclose(out, ref, rtol=2e-2, atol=2e-2), max_err

    print("KERNEL_OK")
</pallas_src>

<mosaic_0001>
module attributes {stable_mosaic.version = 11 : i64} {
  func.func @_encoder_kernel(%arg0: i32, %arg1: memref<2xi32, #tpu.memory_space<smem>>, %arg2: memref<2xi32, #tpu.memory_space<smem>>, %arg3: memref<16x32xf32, #tpu.memory_space<vmem>>, %arg4: memref<1x32xf32, #tpu.memory_space<vmem>>, %arg5: memref<1x32xf32, #tpu.memory_space<vmem>>, %arg6: memref<1x32x96xf32, #tpu.memory_space<vmem>>, %arg7: memref<1x1x96xf32, #tpu.memory_space<vmem>>, %arg8: memref<1x32x32xf32, #tpu.memory_space<vmem>>, %arg9: memref<1x1x32xf32, #tpu.memory_space<vmem>>, %arg10: memref<1x1x32xf32, #tpu.memory_space<vmem>>, %arg11: memref<1x1x32xf32, #tpu.memory_space<vmem>>, %arg12: memref<1x32x64xf32, #tpu.memory_space<vmem>>, %arg13: memref<1x1x64xf32, #tpu.memory_space<vmem>>, %arg14: memref<1x64x32xf32, #tpu.memory_space<vmem>>, %arg15: memref<1x1x32xf32, #tpu.memory_space<vmem>>, %arg16: memref<1x1x32xf32, #tpu.memory_space<vmem>>, %arg17: memref<1x1x32xf32, #tpu.memory_space<vmem>>, %arg18: memref<64x32xf32, #tpu.memory_space<vmem>>, %arg19: memref<1x32xf32, #tpu.memory_space<vmem>>, %arg20: memref<2x32xf32, #tpu.memory_space<vmem>>, %arg21: memref<16x32xf32, #tpu.memory_space<vmem>>) attributes {dimension_semantics = [#tpu.dimension_semantics<arbitrary>], iteration_bounds = array<i64: 2>, scalar_prefetch = 2 : i64, scratch_operands = 1 : i64, tpu.core_type = #tpu.core_type<tc>, window_params = [{pipeline_mode = #tpu.pipeline_mode<synchronous>, transform_indices = @transform_0, window_bounds = array<i64: 16, 32>}, {pipeline_mode = #tpu.pipeline_mode<synchronous>, transform_indices = @transform_1, window_bounds = array<i64: 1, 32>}, {pipeline_mode = #tpu.pipeline_mode<synchronous>, transform_indices = @transform_2, window_bounds = array<i64: 1, 32>}, {transform_indices = @transform_3, window_bounds = array<i64: 1, 32, 96>}, {transform_indices = @transform_4, window_bounds = array<i64: 1, 1, 96>}, {transform_indices = @transform_5, window_bounds = array<i64: 1, 32, 32>}, {transform_indices = @transform_6, window_bounds = array<i64: 1, 1, 32>}, {transform_indices = @transform_7, window_bounds = array<i64: 1, 1, 32>}, {transform_indices = @transform_8, window_bounds = array<i64: 1, 1, 32>}, {transform_indices = @transform_9, window_bounds = array<i64: 1, 32, 64>}, {transform_indices = @transform_10, window_bounds = array<i64: 1, 1, 64>}, {transform_indices = @transform_11, window_bounds = array<i64: 1, 64, 32>}, {transform_indices = @transform_12, window_bounds = array<i64: 1, 1, 32>}, {transform_indices = @transform_13, window_bounds = array<i64: 1, 1, 32>}, {transform_indices = @transform_14, window_bounds = array<i64: 1, 1, 32>}, {pipeline_mode = #tpu.pipeline_mode<synchronous>, transform_indices = @transform_15, window_bounds = array<i64: 64, 32>}, {pipeline_mode = #tpu.pipeline_mode<synchronous>, transform_indices = @transform_16, window_bounds = array<i64: 1, 32>}, {pipeline_mode = #tpu.pipeline_mode<synchronous>, transform_indices = @transform_17, window_bounds = array<i64: 2, 32>}]} {
    %c0_i32 = arith.constant 0 : i32
    %0 = arith.cmpi eq, %arg0, %c0_i32 : i32
    %1 = arith.extui %0 : i1 to i32
    %c0_i32_0 = arith.constant 0 : i32
    %2 = arith.cmpi ne, %1, %c0_i32_0 : i32
    scf.if %2 {
      %c0_78 = arith.constant 0 : index
      %c0_79 = arith.constant 0 : index
      %176 = vector.load %arg3[%c0_78, %c0_79] : memref<16x32xf32, #tpu.memory_space<vmem>>, vector<16x32xf32>
      %c0_80 = arith.constant 0 : index
      %c0_81 = arith.constant 0 : index
      %177 = vector.load %arg4[%c0_80, %c0_81] : memref<1x32xf32, #tpu.memory_space<vmem>>, vector<1x32xf32>
      %c0_82 = arith.constant 0 : index
      %c0_83 = arith.constant 0 : index
      %178 = vector.load %arg5[%c0_82, %c0_83] : memref<1x32xf32, #tpu.memory_space<vmem>>, vector<1x32xf32>
      %cst_84 = arith.constant dense<0.000000e+00> : vector<16xf32>
      %179 = vector.multi_reduction <add>, %176, %cst_84 [1] : vector<16x32xf32> to vector<16xf32>
      %180 = vector.shape_cast %179 : vector<16xf32> to vector<16x1xf32>
      %cst_85 = arith.constant 3.200000e+01 : f32
      %181 = vector.broadcast %cst_85 : f32 to vector<16x1xf32>
      %182 = arith.divf %180, %181 : vector<16x1xf32>
      %183 = vector.broadcast %182 : vector<16x1xf32> to vector<16x32xf32>
      %184 = arith.subf %176, %183 : vector<16x32xf32>
      %185 = arith.mulf %184, %184 : vector<16x32xf32>
      %cst_86 = arith.constant dense<0.000000e+00> : vector<16xf32>
      %186 = vector.multi_reduction <add>, %185, %cst_86 [1] : vector<16x32xf32> to vector<16xf32>
      %187 = vector.shape_cast %186 : vector<16xf32> to vector<16x1xf32>
      %cst_87 = arith.constant 3.200000e+01 : f32
      %188 = vector.broadcast %cst_87 : f32 to vector<16x1xf32>
      %189 = arith.divf %187, %188 : vector<16x1xf32>
      %190 = vector.broadcast %182 : vector<16x1xf32> to vector<16x32xf32>
      %191 = arith.subf %176, %190 : vector<16x32xf32>
      %cst_88 = arith.constant 9.99999996E-13 : f32
      %192 = vector.broadcast %cst_88 : f32 to vector<16x1xf32>
      %193 = arith.addf %189, %192 : vector<16x1xf32>
      %194 = math.rsqrt %193 : vector<16x1xf32>
      %195 = vector.broadcast %194 : vector<16x1xf32> to vector<16x32xf32>
      %196 = arith.mulf %191, %195 : vector<16x32xf32>
      %197 = vector.broadcast %177 : vector<1x32xf32> to vector<16x32xf32>
      %198 = arith.mulf %196, %197 : vector<16x32xf32>
      %199 = vector.broadcast %178 : vector<1x32xf32> to vector<16x32xf32>
      %200 = arith.addf %198, %199 : vector<16x32xf32>
      %c0_89 = arith.constant 0 : index
      %c0_90 = arith.constant 0 : index
      %201 = vector.load %arg21[%c0_89, %c0_90] : memref<16x32xf32, #tpu.memory_space<vmem>>, vector<16x32xf32>
      tpu.vector_store %arg21[%c0_89, %c0_90], %200 {strides = array<i32>} : memref<16x32xf32, #tpu.memory_space<vmem>>, vector<16x32xf32>,
    } else {
    }
    %c0 = arith.constant 0 : index
    %c0_1 = arith.constant 0 : index
    %3 = vector.load %arg21[%c0, %c0_1] : memref<16x32xf32, #tpu.memory_space<vmem>>, vector<16x32xf32>
    %c0_2 = arith.constant 0 : index
    %c0_3 = arith.constant 0 : index
    %c0_4 = arith.constant 0 : index
    %4 = vector.load %arg6[%c0_2, %c0_3, %c0_4] : memref<1x32x96xf32, #tpu.memory_space<vmem>>, vector<1x32x96xf32>
    %5 = vector.shape_cast %4 : vector<1x32x96xf32> to vector<32x96xf32>
    %cst = arith.constant dense<0.000000e+00> : vector<16x96xf32>
    %6 = tpu.matmul %3, %5, %cst {dimension_numbers = #tpu.dot_dimension_numbers<[1], [0], [0], [1], [0, 0, 1, 1], [], []>} : vector<16x32xf32>, vector<32x96xf32>, vector<16x96xf32> -> vector<16x96xf32>
    %c0_5 = arith.constant 0 : index
    %c0_6 = arith.constant 0 : index
    %c0_7 = arith.constant 0 : index
    %7 = vector.load %arg7[%c0_5, %c0_6, %c0_7] : memref<1x1x96xf32, #tpu.memory_space<vmem>>, vector<1x1x96xf32>
    %8 = vector.shape_cast %7 : vector<1x1x96xf32> to vector<1x96xf32>
    %9 = vector.broadcast %8 : vector<1x96xf32> to vector<16x96xf32>
    %10 = arith.addf %6, %9 : vector<16x96xf32>
    %11 = vector.extract_strided_slice %10 {offsets = [0, 0], sizes = [8, 96], strides = [1, 1]} : vector<16x96xf32> to vector<8x96xf32>
    %12 = vector.extract_strided_slice %11 {offsets = [0, 0], sizes = [8, 16], strides = [1, 1]} : vector<8x96xf32> to vector<8x16xf32>
    %cst_8 = arith.constant 2.500000e-01 : f32
    %13 = vector.broadcast %cst_8 : f32 to vector<8x16xf32>
    %14 = arith.mulf %12, %13 : vector<8x16xf32>
    %15 = vector.extract_strided_slice %11 {offsets = [0, 32], sizes = [8, 16], strides = [1, 1]} : vector<8x96xf32> to vector<8x16xf32>
    %16 = vector.extract_strided_slice %11 {offsets = [0, 64], sizes = [8, 16], strides = [1, 1]} : vector<8x96xf32> to vector<8x16xf32>
    %cst_9 = arith.constant dense<0.000000e+00> : vector<8x8xf32>
    %17 = tpu.matmul %14, %15, %cst_9 {dimension_numbers = #tpu.dot_dimension_numbers<[1], [1], [0], [0], [0, 0, 1, 0], [], []>} : vector<8x16xf32>, vector<8x16xf32>, vector<8x8xf32> -> vector<8x8xf32>
    %cst_10 = arith.constant dense<0xFF800000> : vector<8xf32>
    %18 = vector.multi_reduction <maximumf>, %17, %cst_10 [1] : vector<8x8xf32> to vector<8xf32>
    %19 = vector.shape_cast %18 : vector<8xf32> to vector<8x1xf32>
    %20 = vector.broadcast %19 : vector<8x1xf32> to vector<8x8xf32>
    %21 = arith.subf %17, %20 : vector<8x8xf32>
    %22 = math.exp %21 : vector<8x8xf32>
    %cst_11 = arith.constant dense<0.000000e+00> : vector<8xf32>
    %23 = vector.multi_reduction <add>, %22, %cst_11 [1] : vector<8x8xf32> to vector<8xf32>
    %24 = vector.shape_cast %23 : vector<8xf32> to vector<8x1xf32>
    %25 = tpu.reciprocal %24 {approx = true} : vector<8x1xf32> -> vector<8x1xf32>
    %26 = vector.broadcast %25 : vector<8x1xf32> to vector<8x8xf32>
    %27 = arith.mulf %22, %26 : vector<8x8xf32>
    %cst_12 = arith.constant dense<0.000000e+00> : vector<8x16xf32>
    %28 = tpu.matmul %27, %16, %cst_12 {dimension_numbers = #tpu.dot_dimension_numbers<[1], [0], [0], [1], [0, 0, 1, 1], [], []>} : vector<8x8xf32>, vector<8x16xf32>, vector<8x16xf32> -> vector<8x16xf32>
    %29 = vector.extract_strided_slice %11 {offsets = [0, 16], sizes = [8, 16], strides = [1, 1]} : vector<8x96xf32> to vector<8x16xf32>
    %cst_13 = arith.constant 2.500000e-01 : f32
    %30 = vector.broadcast %cst_13 : f32 to vector<8x16xf32>
    %31 = arith.mulf %29, %30 : vector<8x16xf32>
    %32 = vector.extract_strided_slice %11 {offsets = [0, 48], sizes = [8, 16], strides = [1, 1]} : vector<8x96xf32> to vector<8x16xf32>
    %33 = vector.extract_strided_slice %11 {offsets = [0, 80], sizes = [8, 16], strides = [1, 1]} : vector<8x96xf32> to vector<8x16xf32>
    %cst_14 = arith.constant dense<0.000000e+00> : vector<8x8xf32>
    %34 = tpu.matmul %31, %32, %cst_14 {dimension_numbers = #tpu.dot_dimension_numbers<[1], [1], [0], [0], [0, 0, 1, 0], [], []>} : vector<8x16xf32>, vector<8x16xf32>, vector<8x8xf32> -> vector<8x8xf32>
    %cst_15 = arith.constant dense<0xFF800000> : vector<8xf32>
    %35 = vector.multi_reduction <maximumf>, %34, %cst_15 [1] : vector<8x8xf32> to vector<8xf32>
    %36 = vector.shape_cast %35 : vector<8xf32> to vector<8x1xf32>
    %37 = vector.broadcast %36 : vector<8x1xf32> to vector<8x8xf32>
    %38 = arith.subf %34, %37 : vector<8x8xf32>
    %39 = math.exp %38 : vector<8x8xf32>
    %cst_16 = arith.constant dense<0.000000e+00> : vector<8xf32>
    %40 = vector.multi_reduction <add>, %39, %cst_16 [1] : vector<8x8xf32> to vector<8xf32>
    %41 = vector.shape_cast %40 : vector<8xf32> to vector<8x1xf32>
    %42 = tpu.reciprocal %41 {approx = true} : vector<8x1xf32> -> vector<8x1xf32>
    %43 = vector.broadcast %42 : vector<8x1xf32> to vector<8x8xf32>
    %44 = arith.mulf %39, %43 : vector<8x8xf32>
    %cst_17 = arith.constant dense<0.000000e+00> : vector<8x16xf32>
    %45 = tpu.matmul %44, %33, %cst_17 {dimension_numbers = #tpu.dot_dimension_numbers<[1], [0], [0], [1], [0, 0, 1, 1], [], []>} : vector<8x8xf32>, vector<8x16xf32>, vector<8x16xf32> -> vector<8x16xf32>
    %46 = tpu.concatenate %28, %45 in 1 : vector<8x16xf32>, vector<8x16xf32> -> vector<8x32xf32>
    %47 = vector.extract_strided_slice %10 {offsets = [8, 0], sizes = [8, 96], strides = [1, 1]} : vector<16x96xf32> to vector<8x96xf32>
    %48 = vector.extract_strided_slice %47 {offsets = [0, 0], sizes = [8, 16], strides = [1, 1]} : vector<8x96xf32> to vector<8x16xf32>
    %cst_18 = arith.constant 2.500000e-01 : f32
    %49 = vector.broadcast %cst_18 : f32 to vector<8x16xf32>
    %50 = arith.mulf %48, %49 : vector<8x16xf32>
    %51 = vector.extract_strided_slice %47 {offsets = [0, 32], sizes = [8, 16], strides = [1, 1]} : vector<8x96xf32> to vector<8x16xf32>
    %52 = vector.extract_strided_slice %47 {offsets = [0, 64], sizes = [8, 16], strides = [1, 1]} : vector<8x96xf32> to vector<8x16xf32>
    %cst_19 = arith.constant dense<0.000000e+00> : vector<8x8xf32>
    %53 = tpu.matmul %50, %51, %cst_19 {dimension_numbers = #tpu.dot_dimension_numbers<[1], [1], [0], [0], [0, 0, 1, 0], [], []>} : vector<8x16xf32>, vector<8x16xf32>, vector<8x8xf32> -> vector<8x8xf32>
    %cst_20 = arith.constant dense<0xFF800000> : vector<8xf32>
    %54 = vector.multi_reduction <maximumf>, %53, %cst_20 [1] : vector<8x8xf32> to vector<8xf32>
    %55 = vector.shape_cast %54 : vector<8xf32> to vector<8x1xf32>
    %56 = vector.broadcast %55 : vector<8x1xf32> to vector<8x8xf32>
    %57 = arith.subf %53, %56 : vector<8x8xf32>
    %58 = math.exp %57 : vector<8x8xf32>
    %cst_21 = arith.constant dense<0.000000e+00> : vector<8xf32>
    %59 = vector.multi_reduction <add>, %58, %cst_21 [1] : vector<8x8xf32> to vector<8xf32>
    %60 = vector.shape_cast %59 : vector<8xf32> to vector<8x1xf32>
    %61 = tpu.reciprocal %60 {approx = true} : vector<8x1xf32> -> vector<8x1xf32>
    %62 = vector.broadcast %61 : vector<8x1xf32> to vector<8x8xf32>
    %63 = arith.mulf %58, %62 : vector<8x8xf32>
    %cst_22 = arith.constant dense<0.000000e+00> : vector<8x16xf32>
    %64 = tpu.matmul %63, %52, %cst_22 {dimension_numbers = #tpu.dot_dimension_numbers<[1], [0], [0], [1], [0, 0, 1, 1], [], []>} : vector<8x8xf32>, vector<8x16xf32>, vector<8x16xf32> -> vector<8x16xf32>
    %65 = vector.extract_strided_slice %47 {offsets = [0, 16], sizes = [8, 16], strides = [1, 1]} : vector<8x96xf32> to vector<8x16xf32>
    %cst_23 = arith.constant 2.500000e-01 : f32
    %66 = vector.broadcast %cst_23 : f32 to vector<8x16xf32>
    %67 = arith.mulf %65, %66 : vector<8x16xf32>
    %68 = vector.extract_strided_slice %47 {offsets = [0, 48], sizes = [8, 16], strides = [1, 1]} : vector<8x96xf32> to vector<8x16xf32>
    %69 = vector.extract_strided_slice %47 {offsets = [0, 80], sizes = [8, 16], strides = [1, 1]} : vector<8x96xf32> to vector<8x16xf32>
    %cst_24 = arith.constant dense<0.000000e+00> : vector<8x8xf32>
    %70 = tpu.matmul %67, %68, %cst_24 {dimension_numbers = #tpu.dot_dimension_numbers<[1], [1], [0], [0], [0, 0, 1, 0], [], []>} : vector<8x16xf32>, vector<8x16xf32>, vector<8x8xf32> -> vector<8x8xf32>
    %cst_25 = arith.constant dense<0xFF800000> : vector<8xf32>
    %71 = vector.multi_reduction <maximumf>, %70, %cst_25 [1] : vector<8x8xf32> to vector<8xf32>
    %72 = vector.shape_cast %71 : vector<8xf32> to vector<8x1xf32>
    %73 = vector.broadcast %72 : vector<8x1xf32> to vector<8x8xf32>
    %74 = arith.subf %70, %73 : vector<8x8xf32>
    %75 = math.exp %74 : vector<8x8xf32>
    %cst_26 = arith.constant dense<0.000000e+00> : vector<8xf32>
    %76 = vector.multi_reduction <add>, %75, %cst_26 [1] : vector<8x8xf32> to vector<8xf32>
    %77 = vector.shape_cast %76 : vector<8xf32> to vector<8x1xf32>
    %78 = tpu.reciprocal %77 {approx = true} : vector<8x1xf32> -> vector<8x1xf32>
    %79 = vector.broadcast %78 : vector<8x1xf32> to vector<8x8xf32>
    %80 = arith.mulf %75, %79 : vector<8x8xf32>
    %cst_27 = arith.constant dense<0.000000e+00> : vector<8x16xf32>
    %81 = tpu.matmul %80, %69, %cst_27 {dimension_numbers = #tpu.dot_dimension_numbers<[1], [0], [0], [1], [0, 0, 1, 1], [], []>} : vector<8x8xf32>, vector<8x16xf32>, vector<8x16xf32> -> vector<8x16xf32>
    %82 = tpu.concatenate %64, %81 in 1 : vector<8x16xf32>, vector<8x16xf32> -> vector<8x32xf32>
    %83 = tpu.concatenate %46, %82 in 0 : vector<8x32xf32>, vector<8x32xf32> -> vector<16x32xf32>
    %c0_28 = arith.constant 0 : index
    %c0_29 = arith.constant 0 : index
    %c0_30 = arith.constant 0 : index
    %84 = vector.load %arg8[%c0_28, %c0_29, %c0_30] : memref<1x32x32xf32, #tpu.memory_space<vmem>>, vector<1x32x32xf32>
    %85 = vector.shape_cast %84 : vector<1x32x32xf32> to vector<32x32xf32>
    %cst_31 = arith.constant dense<0.000000e+00> : vector<16x32xf32>
    %86 = tpu.matmul %83, %85, %cst_31 {dimension_numbers = #tpu.dot_dimension_numbers<[1], [0], [0], [1], [0, 0, 1, 1], [], []>} : vector<16x32xf32>, vector<32x32xf32>, vector<16x32xf32> -> vector<16x32xf32>
    %c0_32 = arith.constant 0 : index
    %c0_33 = arith.constant 0 : index
    %c0_34 = arith.constant 0 : index
    %87 = vector.load %arg9[%c0_32, %c0_33, %c0_34] : memref<1x1x32xf32, #tpu.memory_space<vmem>>, vector<1x1x32xf32>
    %88 = vector.shape_cast %87 : vector<1x1x32xf32> to vector<1x32xf32>
    %89 = vector.broadcast %88 : vector<1x32xf32> to vector<16x32xf32>
    %90 = arith.addf %86, %89 : vector<16x32xf32>
    %91 = arith.addf %90, %3 : vector<16x32xf32>
    %c0_35 = arith.constant 0 : index
    %c0_36 = arith.constant 0 : index
    %c0_37 = arith.constant 0 : index
    %92 = vector.load %arg10[%c0_35, %c0_36, %c0_37] : memref<1x1x32xf32, #tpu.memory_space<vmem>>, vector<1x1x32xf32>
    %93 = vector.shape_cast %92 : vector<1x1x32xf32> to vector<1x32xf32>
    %c0_38 = arith.constant 0 : index
    %c0_39 = arith.constant 0 : index
    %c0_40 = arith.constant 0 : index
    %94 = vector.load %arg11[%c0_38, %c0_39, %c0_40] : memref<1x1x32xf32, #tpu.memory_space<vmem>>, vector<1x1x32xf32>
    %95 = vector.shape_cast %94 : vector<1x1x32xf32> to vector<1x32xf32>
    %cst_41 = arith.constant dense<0.000000e+00> : vector<16xf32>
    %96 = vector.multi_reduction <add>, %91, %cst_41 [1] : vector<16x32xf32> to vector<16xf32>
    %97 = vector.shape_cast %96 : vector<16xf32> to vector<16x1xf32>
    %cst_42 = arith.constant 3.200000e+01 : f32
    %98 = vector.broadcast %cst_42 : f32 to vector<16x1xf32>
    %99 = arith.divf %97, %98 : vector<16x1xf32>
    %100 = vector.broadcast %99 : vector<16x1xf32> to vector<16x32xf32>
    %101 = arith.subf %91, %100 : vector<16x32xf32>
    %102 = arith.mulf %101, %101 : vector<16x32xf32>
    %cst_43 = arith.constant dense<0.000000e+00> : vector<16xf32>
    %103 = vector.multi_reduction <add>, %102, %cst_43 [1] : vector<16x32xf32> to vector<16xf32>
    %104 = vector.shape_cast %103 : vector<16xf32> to vector<16x1xf32>
    %cst_44 = arith.constant 3.200000e+01 : f32
    %105 = vector.broadcast %cst_44 : f32 to vector<16x1xf32>
    %106 = arith.divf %104, %105 : vector<16x1xf32>
    %107 = vector.broadcast %99 : vector<16x1xf32> to vector<16x32xf32>
    %108 = arith.subf %91, %107 : vector<16x32xf32>
    %cst_45 = arith.constant 9.99999996E-13 : f32
    %109 = vector.broadcast %cst_45 : f32 to vector<16x1xf32>
    %110 = arith.addf %106, %109 : vector<16x1xf32>
    %111 = math.rsqrt %110 : vector<16x1xf32>
    %112 = vector.broadcast %111 : vector<16x1xf32> to vector<16x32xf32>
    %113 = arith.mulf %108, %112 : vector<16x32xf32>
    %114 = vector.broadcast %93 : vector<1x32xf32> to vector<16x32xf32>
    %115 = arith.mulf %113, %114 : vector<16x32xf32>
    %116 = vector.broadcast %95 : vector<1x32xf32> to vector<16x32xf32>
    %117 = arith.addf %115, %116 : vector<16x32xf32>
    %c0_46 = arith.constant 0 : index
    %c0_47 = arith.constant 0 : index
    %c0_48 = arith.constant 0 : index
    %118 = vector.load %arg12[%c0_46, %c0_47, %c0_48] : memref<1x32x64xf32, #tpu.memory_space<vmem>>, vector<1x32x64xf32>
    %119 = vector.shape_cast %118 : vector<1x32x64xf32> to vector<32x64xf32>
    %cst_49 = arith.constant dense<0.000000e+00> : vector<16x64xf32>
    %120 = tpu.matmul %117, %119, %cst_49 {dimension_numbers = #tpu.dot_dimension_numbers<[1], [0], [0], [1], [0, 0, 1, 1], [], []>} : vector<16x32xf32>, vector<32x64xf32>, vector<16x64xf32> -> vector<16x64xf32>
    %c0_50 = arith.constant 0 : index
    %c0_51 = arith.constant 0 : index
    %c0_52 = arith.constant 0 : index
    %121 = vector.load %arg13[%c0_50, %c0_51, %c0_52] : memref<1x1x64xf32, #tpu.memory_space<vmem>>, vector<1x1x64xf32>
    %122 = vector.shape_cast %121 : vector<1x1x64xf32> to vector<1x64xf32>
    %123 = vector.broadcast %122 : vector<1x64xf32> to vector<16x64xf32>
    %124 = arith.addf %120, %123 : vector<16x64xf32>
    %cst_53 = arith.constant 5.000000e-01 : f32
    %125 = vector.broadcast %cst_53 : f32 to vector<16x64xf32>
    %126 = arith.mulf %125, %124 : vector<16x64xf32>
    %cst_54 = arith.constant 4.471500e-02 : f32
    %127 = vector.broadcast %cst_54 : f32 to vector<16x64xf32>
    %128 = arith.mulf %127, %124 : vector<16x64xf32>
    %129 = arith.mulf %128, %124 : vector<16x64xf32>
    %130 = arith.mulf %129, %124 : vector<16x64xf32>
    %131 = arith.addf %124, %130 : vector<16x64xf32>
    %cst_55 = arith.constant 0.797884583 : f32
    %132 = vector.broadcast %cst_55 : f32 to vector<16x64xf32>
    %133 = arith.mulf %132, %131 : vector<16x64xf32>
    %134 = math.tanh %133 : vector<16x64xf32>
    %cst_56 = arith.constant 1.000000e+00 : f32
    %135 = vector.broadcast %cst_56 : f32 to vector<16x64xf32>
    %136 = arith.addf %135, %134 : vector<16x64xf32>
    %137 = arith.mulf %126, %136 : vector<16x64xf32>
    %c0_57 = arith.constant 0 : index
    %c0_58 = arith.constant 0 : index
    %c0_59 = arith.constant 0 : index
    %138 = vector.load %arg14[%c0_57, %c0_58, %c0_59] : memref<1x64x32xf32, #tpu.memory_space<vmem>>, vector<1x64x32xf32>
    %139 = vector.shape_cast %138 : vector<1x64x32xf32> to vector<64x32xf32>
    %cst_60 = arith.constant dense<0.000000e+00> : vector<16x32xf32>
    %140 = tpu.matmul %137, %139, %cst_60 {dimension_numbers = #tpu.dot_dimension_numbers<[1], [0], [0], [1], [0, 0, 1, 1], [], []>} : vector<16x64xf32>, vector<64x32xf32>, vector<16x32xf32> -> vector<16x32xf32>
    %c0_61 = arith.constant 0 : index
    %c0_62 = arith.constant 0 : index
    %c0_63 = arith.constant 0 : index
    %141 = vector.load %arg15[%c0_61, %c0_62, %c0_63] : memref<1x1x32xf32, #tpu.memory_space<vmem>>, vector<1x1x32xf32>
    %142 = vector.shape_cast %141 : vector<1x1x32xf32> to vector<1x32xf32>
    %143 = vector.broadcast %142 : vector<1x32xf32> to vector<16x32xf32>
    %144 = arith.addf %140, %143 : vector<16x32xf32>
    %145 = arith.addf %144, %117 : vector<16x32xf32>
    %c0_64 = arith.constant 0 : index
    %c0_65 = arith.constant 0 : index
    %c0_66 = arith.constant 0 : index
    %146 = vector.load %arg16[%c0_64, %c0_65, %c0_66] : memref<1x1x32xf32, #tpu.memory_space<vmem>>, vector<1x1x32xf32>
    %147 = vector.shape_cast %146 : vector<1x1x32xf32> to vector<1x32xf32>
    %c0_67 = arith.constant 0 : index
    %c0_68 = arith.constant 0 : index
    %c0_69 = arith.constant 0 : index
    %148 = vector.load %arg17[%c0_67, %c0_68, %c0_69] : memref<1x1x32xf32, #tpu.memory_space<vmem>>, vector<1x1x32xf32>
    %149 = vector.shape_cast %148 : vector<1x1x32xf32> to vector<1x32xf32>
    %cst_70 = arith.constant dense<0.000000e+00> : vector<16xf32>
    %150 = vector.multi_reduction <add>, %145, %cst_70 [1] : vector<16x32xf32> to vector<16xf32>
    %151 = vector.shape_cast %150 : vector<16xf32> to vector<16x1xf32>
    %cst_71 = arith.constant 3.200000e+01 : f32
    %152 = vector.broadcast %cst_71 : f32 to vector<16x1xf32>
    %153 = arith.divf %151, %152 : vector<16x1xf32>
    %154 = vector.broadcast %153 : vector<16x1xf32> to vector<16x32xf32>
    %155 = arith.subf %145, %154 : vector<16x32xf32>
    %156 = arith.mulf %155, %155 : vector<16x32xf32>
    %cst_72 = arith.constant dense<0.000000e+00> : vector<16xf32>
    %157 = vector.multi_reduction <add>, %156, %cst_72 [1] : vector<16x32xf32> to vector<16xf32>
    %158 = vector.shape_cast %157 : vector<16xf32> to vector<16x1xf32>
    %cst_73 = arith.constant 3.200000e+01 : f32
    %159 = vector.broadcast %cst_73 : f32 to vector<16x1xf32>
    %160 = arith.divf %158, %159 : vector<16x1xf32>
    %161 = vector.broadcast %153 : vector<16x1xf32> to vector<16x32xf32>
    %162 = arith.subf %145, %161 : vector<16x32xf32>
    %cst_74 = arith.constant 9.99999996E-13 : f32
    %163 = vector.broadcast %cst_74 : f32 to vector<16x1xf32>
    %164 = arith.addf %160, %163 : vector<16x1xf32>
    %165 = math.rsqrt %164 : vector<16x1xf32>
    %166 = vector.broadcast %165 : vector<16x1xf32> to vector<16x32xf32>
    %167 = arith.mulf %162, %166 : vector<16x32xf32>
    %168 = vector.broadcast %147 : vector<1x32xf32> to vector<16x32xf32>
    %169 = arith.mulf %167, %168 : vector<16x32xf32>
    %170 = vector.broadcast %149 : vector<1x32xf32> to vector<16x32xf32>
    %171 = arith.addf %169, %170 : vector<16x32xf32>
    %c0_75 = arith.constant 0 : index
    %c0_76 = arith.constant 0 : index
    %172 = vector.load %arg21[%c0_75, %c0_76] : memref<16x32xf32, #tpu.memory_space<vmem>>, vector<16x32xf32>
    tpu.vector_store %arg21[%c0_75, %c0_76], %171 {strides = array<i32>} : memref<16x32xf32, #tpu.memory_space<vmem>>, vector<16x32xf32>,
    %c1_i32 = arith.constant 1 : i32
    %173 = arith.cmpi eq, %arg0, %c1_i32 : i32
    %174 = arith.extui %173 : i1 to i32
    %c0_i32_77 = arith.constant 0 : i32
    %175 = arith.cmpi ne, %174, %c0_i32_77 : i32
    scf.if %175 {
      %c0_78 = arith.constant 0 : index
      %c0_79 = arith.constant 0 : index
      %176 = vector.load %arg21[%c0_78, %c0_79] : memref<16x32xf32, #tpu.memory_space<vmem>>, vector<16x32xf32>
      %177 = tpu.iota {dimensions = array<i32: 1>} : vector<1x16xi32>
      %c0_80 = arith.constant 0 : index
      %178 = memref.load %arg1[%c0_80] : memref<2xi32, #tpu.memory_space<smem>>
      %179 = vector.broadcast %178 : i32 to vector<1x16xi32>
      %180 = arith.cmpi eq, %177, %179 : vector<1x16xi32>
      %181 = arith.extui %180 : vector<1x16xi1> to vector<1x16xi32>
      %182 = arith.sitofp %181 : vector<1x16xi32> to vector<1x16xf32>
      %c0_81 = arith.constant 0 : index
      %183 = memref.load %arg2[%c0_81] : memref<2xi32, #tpu.memory_space<smem>>
      %184 = vector.broadcast %183 : i32 to vector<1x16xi32>
      %185 = arith.cmpi eq, %177, %184 : vector<1x16xi32>
      %186 = arith.extui %185 : vector<1x16xi1> to vector<1x16xi32>
      %187 = arith.sitofp %186 : vector<1x16xi32> to vector<1x16xf32>
      %c1 = arith.constant 1 : index
      %188 = memref.load %arg1[%c1] : memref<2xi32, #tpu.memory_space<smem>>
      %189 = vector.broadcast %188 : i32 to vector<1x16xi32>
      %190 = arith.cmpi eq, %177, %189 : vector<1x16xi32>
      %191 = arith.extui %190 : vector<1x16xi1> to vector<1x16xi32>
      %192 = arith.sitofp %191 : vector<1x16xi32> to vector<1x16xf32>
      %c1_82 = arith.constant 1 : index
      %193 = memref.load %arg2[%c1_82] : memref<2xi32, #tpu.memory_space<smem>>
      %194 = vector.broadcast %193 : i32 to vector<1x16xi32>
      %195 = arith.cmpi eq, %177, %194 : vector<1x16xi32>
      %196 = arith.extui %195 : vector<1x16xi1> to vector<1x16xi32>
      %197 = arith.sitofp %196 : vector<1x16xi32> to vector<1x16xf32>
      %198 = tpu.concatenate %182, %192 in 0 : vector<1x16xf32>, vector<1x16xf32> -> vector<2x16xf32>
      %199 = tpu.concatenate %187, %197 in 0 : vector<1x16xf32>, vector<1x16xf32> -> vector<2x16xf32>
      %cst_83 = arith.constant dense<0.000000e+00> : vector<2x32xf32>
      %200 = tpu.matmul %198, %176, %cst_83 {dimension_numbers = #tpu.dot_dimension_numbers<[1], [0], [0], [1], [0, 0, 1, 1], [], []>} : vector<2x16xf32>, vector<16x32xf32>, vector<2x32xf32> -> vector<2x32xf32>
      %cst_84 = arith.constant dense<0.000000e+00> : vector<2x32xf32>
      %201 = tpu.matmul %199, %176, %cst_84 {dimension_numbers = #tpu.dot_dimension_numbers<[1], [0], [0], [1], [0, 0, 1, 1], [], []>} : vector<2x16xf32>, vector<16x32xf32>, vector<2x32xf32> -> vector<2x32xf32>
      %c0_85 = arith.constant 0 : index
      %c0_86 = arith.constant 0 : index
      %202 = vector.load %arg18[%c0_85, %c0_86] : memref<64x32xf32, #tpu.memory_space<vmem>>, vector<32x32xf32>
      %cst_87 = arith.constant dense<0.000000e+00> : vector<2x32xf32>
      %203 = tpu.matmul %200, %202, %cst_87 {dimension_numbers = #tpu.dot_dimension_numbers<[1], [0], [0], [1], [0, 0, 1, 1], [], []>} : vector<2x32xf32>, vector<32x32xf32>, vector<2x32xf32> -> vector<2x32xf32>
      %c32 = arith.constant 32 : index
      %c0_88 = arith.constant 0 : index
      %204 = vector.load %arg18[%c32, %c0_88] : memref<64x32xf32, #tpu.memory_space<vmem>>, vector<32x32xf32>
      %cst_89 = arith.constant dense<0.000000e+00> : vector<2x32xf32>
      %205 = tpu.matmul %201, %204, %cst_89 {dimension_numbers = #tpu.dot_dimension_numbers<[1], [0], [0], [1], [0, 0, 1, 1], [], []>} : vector<2x32xf32>, vector<32x32xf32>, vector<2x32xf32> -> vector<2x32xf32>
      %206 = arith.addf %203, %205 : vector<2x32xf32>
      %c0_90 = arith.constant 0 : index
      %c0_91 = arith.constant 0 : index
      %207 = vector.load %arg19[%c0_90, %c0_91] : memref<1x32xf32, #tpu.memory_space<vmem>>, vector<1x32xf32>
      %208 = vector.broadcast %207 : vector<1x32xf32> to vector<2x32xf32>
      %209 = arith.addf %206, %208 : vector<2x32xf32>
      %c0_92 = arith.constant 0 : index
      %c0_93 = arith.constant 0 : index
      %210 = vector.load %arg20[%c0_92, %c0_93] : memref<2x32xf32, #tpu.memory_space<vmem>>, vector<2x32xf32>
      tpu.vector_store %arg20[%c0_92, %c0_93], %209 {strides = array<i32>} : memref<2x32xf32, #tpu.memory_space<vmem>>, vector<2x32xf32>,
    } else {
    }
    return
  }
  func.func @transform_0(%arg0: i32, %arg1: memref<2xi32, #tpu.memory_space<smem>>, %arg2: memref<2xi32, #tpu.memory_space<smem>>) -> (i32, i32) {
    %c0_i32 = arith.constant 0 : i32
    %c0_i32_0 = arith.constant 0 : i32
    %c0_i32_1 = arith.constant 0 : i32
    return %c0_i32, %c0_i32_0 : i32, i32
  }
  func.func @transform_1(%arg0: i32, %arg1: memref<2xi32, #tpu.memory_space<smem>>, %arg2: memref<2xi32, #tpu.memory_space<smem>>) -> (i32, i32) {
    %c0_i32 = arith.constant 0 : i32
    %c0_i32_0 = arith.constant 0 : i32
    %c0_i32_1 = arith.constant 0 : i32
    return %c0_i32, %c0_i32_0 : i32, i32
  }
  func.func @transform_2(%arg0: i32, %arg1: memref<2xi32, #tpu.memory_space<smem>>, %arg2: memref<2xi32, #tpu.memory_space<smem>>) -> (i32, i32) {
    %c0_i32 = arith.constant 0 : i32
    %c0_i32_0 = arith.constant 0 : i32
    %c0_i32_1 = arith.constant 0 : i32
    return %c0_i32, %c0_i32_0 : i32, i32
  }
  func.func @transform_3(%arg0: i32, %arg1: memref<2xi32, #tpu.memory_space<smem>>, %arg2: memref<2xi32, #tpu.memory_space<smem>>) -> (i32, i32, i32) {
    %c0_i32 = arith.constant 0 : i32
    %c0_i32_0 = arith.constant 0 : i32
    %c0_i32_1 = arith.constant 0 : i32
    return %arg0, %c0_i32, %c0_i32_0 : i32, i32, i32
  }
  func.func @transform_4(%arg0: i32, %arg1: memref<2xi32, #tpu.memory_space<smem>>, %arg2: memref<2xi32, #tpu.memory_space<smem>>) -> (i32, i32, i32) {
    %c0_i32 = arith.constant 0 : i32
    %c0_i32_0 = arith.constant 0 : i32
    %c0_i32_1 = arith.constant 0 : i32
    return %arg0, %c0_i32, %c0_i32_0 : i32, i32, i32
  }
  func.func @transform_5(%arg0: i32, %arg1: memref<2xi32, #tpu.memory_space<smem>>, %arg2: memref<2xi32, #tpu.memory_space<smem>>) -> (i32, i32, i32) {
    %c0_i32 = arith.constant 0 : i32
    %c0_i32_0 = arith.constant 0 : i32
    %c0_i32_1 = arith.constant 0 : i32
    return %arg0, %c0_i32, %c0_i32_0 : i32, i32, i32
  }
  func.func @transform_6(%arg0: i32, %arg1: memref<2xi32, #tpu.memory_space<smem>>, %arg2: memref<2xi32, #tpu.memory_space<smem>>) -> (i32, i32, i32) {
    %c0_i32 = arith.constant 0 : i32
    %c0_i32_0 = arith.constant 0 : i32
    %c0_i32_1 = arith.constant 0 : i32
    return %arg0, %c0_i32, %c0_i32_0 : i32, i32, i32
  }
  func.func @transform_7(%arg0: i32, %arg1: memref<2xi32, #tpu.memory_space<smem>>, %arg2: memref<2xi32, #tpu.memory_space<smem>>) -> (i32, i32, i32) {
    %c0_i32 = arith.constant 0 : i32
    %c0_i32_0 = arith.constant 0 : i32
    %c0_i32_1 = arith.constant 0 : i32
    return %arg0, %c0_i32, %c0_i32_0 : i32, i32, i32
  }
  func.func @transform_8(%arg0: i32, %arg1: memref<2xi32, #tpu.memory_space<smem>>, %arg2: memref<2xi32, #tpu.memory_space<smem>>) -> (i32, i32, i32) {
    %c0_i32 = arith.constant 0 : i32
    %c0_i32_0 = arith.constant 0 : i32
    %c0_i32_1 = arith.constant 0 : i32
    return %arg0, %c0_i32, %c0_i32_0 : i32, i32, i32
  }
  func.func @transform_9(%arg0: i32, %arg1: memref<2xi32, #tpu.memory_space<smem>>, %arg2: memref<2xi32, #tpu.memory_space<smem>>) -> (i32, i32, i32) {
    %c0_i32 = arith.constant 0 : i32
    %c0_i32_0 = arith.constant 0 : i32
    %c0_i32_1 = arith.constant 0 : i32
    return %arg0, %c0_i32, %c0_i32_0 : i32, i32, i32
  }
  func.func @transform_10(%arg0: i32, %arg1: memref<2xi32, #tpu.memory_space<smem>>, %arg2: memref<2xi32, #tpu.memory_space<smem>>) -> (i32, i32, i32) {
    %c0_i32 = arith.constant 0 : i32
    %c0_i32_0 = arith.constant 0 : i32
    %c0_i32_1 = arith.constant 0 : i32
    return %arg0, %c0_i32, %c0_i32_0 : i32, i32, i32
  }
  func.func @transform_11(%arg0: i32, %arg1: memref<2xi32, #tpu.memory_space<smem>>, %arg2: memref<2xi32, #tpu.memory_space<smem>>) -> (i32, i32, i32) {
    %c0_i32 = arith.constant 0 : i32
    %c0_i32_0 = arith.constant 0 : i32
    %c0_i32_1 = arith.constant 0 : i32
    return %arg0, %c0_i32, %c0_i32_0 : i32, i32, i32
  }
  func.func @transform_12(%arg0: i32, %arg1: memref<2xi32, #tpu.memory_space<smem>>, %arg2: memref<2xi32, #tpu.memory_space<smem>>) -> (i32, i32, i32) {
    %c0_i32 = arith.constant 0 : i32
    %c0_i32_0 = arith.constant 0 : i32
    %c0_i32_1 = arith.constant 0 : i32
    return %arg0, %c0_i32, %c0_i32_0 : i32, i32, i32
  }
  func.func @transform_13(%arg0: i32, %arg1: memref<2xi32, #tpu.memory_space<smem>>, %arg2: memref<2xi32, #tpu.memory_space<smem>>) -> (i32, i32, i32) {
    %c0_i32 = arith.constant 0 : i32
    %c0_i32_0 = arith.constant 0 : i32
    %c0_i32_1 = arith.constant 0 : i32
    return %arg0, %c0_i32, %c0_i32_0 : i32, i32, i32
  }
  func.func @transform_14(%arg0: i32, %arg1: memref<2xi32, #tpu.memory_space<smem>>, %arg2: memref<2xi32, #tpu.memory_space<smem>>) -> (i32, i32, i32) {
    %c0_i32 = arith.constant 0 : i32
    %c0_i32_0 = arith.constant 0 : i32
    %c0_i32_1 = arith.constant 0 : i32
    return %arg0, %c0_i32, %c0_i32_0 : i32, i32, i32
  }
  func.func @transform_15(%arg0: i32, %arg1: memref<2xi32, #tpu.memory_space<smem>>, %arg2: memref<2xi32, #tpu.memory_space<smem>>) -> (i32, i32) {
    %c0_i32 = arith.constant 0 : i32
    %c0_i32_0 = arith.constant 0 : i32
    %c0_i32_1 = arith.constant 0 : i32
    return %c0_i32, %c0_i32_0 : i32, i32
  }
  func.func @transform_16(%arg0: i32, %arg1: memref<2xi32, #tpu.memory_space<smem>>, %arg2: memref<2xi32, #tpu.memory_space<smem>>) -> (i32, i32) {
    %c0_i32 = arith.constant 0 : i32
    %c0_i32_0 = arith.constant 0 : i32
    %c0_i32_1 = arith.constant 0 : i32
    return %c0_i32, %c0_i32_0 : i32, i32
  }
  func.func @transform_17(%arg0: i32, %arg1: memref<2xi32, #tpu.memory_space<smem>>, %arg2: memref<2xi32, #tpu.memory_space<smem>>) -> (i32, i32) {
    %c0_i32 = arith.constant 0 : i32
    %c0_i32_0 = arith.constant 0 : i32
    %c0_i32_1 = arith.constant 0 : i32
    return %c0_i32, %c0_i32_0 : i32, i32
  }
}

</mosaic_0001>

<bundles_post_ra>
// kernel: bert_encoder_forward.1
= control target key start
LH: loop header
LB: loop body
LE: loop exit
PB: predicated region body
PF: predicated region fallthrough
CT: control target
= control target key end

     0   :  { %s3210_s0 = inlined_call_operand.vmem [shape: s32[2], index: 0, kind: input, shape index: {}]   ;;  %s3211_s2 = inlined_call_operand.vmem [shape: f32[16,32], index: 2, kind: input, shape index: {}]   ;;  %s3212_s3 = inlined_call_operand.vmem [shape: f32[1,32], index: 3, kind: input, shape index: {}]   ;;  %s3213_s4 = inlined_call_operand.vmem [shape: f32[1,32], index: 4, kind: input, shape index: {}]   ;;  %s3214_s5 = inlined_call_operand.vmem [shape: f32[2,32,96], index: 5, kind: input, shape index: {}]   ;;  %s3215_s6 = inlined_call_operand.vmem [shape: f32[2,1,96], index: 6, kind: input, shape index: {}]   ;;  %s3216_s7 = inlined_call_operand.vmem [shape: f32[2,32,32], index: 7, kind: input, shape index: {}]   ;;  %s3217_s8 = inlined_call_operand.vmem [shape: f32[2,1,32], index: 8, kind: input, shape index: {}]   ;;  %s3218_s9 = inlined_call_operand.vmem [shape: f32[2,1,32], index: 9, kind: input, shape index: {}]   ;;  %s3219_s10 = inlined_call_operand.vmem [shape: f32[2,1,32], index: 10, kind: input, shape index: {}]   ;;  %s3220_s11 = inlined_call_operand.vmem [shape: f32[2,32,64], index: 11, kind: input, shape index: {}]   ;;  %s3221_s12 = inlined_call_operand.vmem [shape: f32[2,1,64], index: 12, kind: input, shape index: {}]   ;;  %s3222_s13 = inlined_call_operand.vmem [shape: f32[2,64,32], index: 13, kind: input, shape index: {}]   ;;  %s3223_s14 = inlined_call_operand.vmem [shape: f32[2,1,32], index: 14, kind: input, shape index: {}]   ;;  %s3224_s15 = inlined_call_operand.vmem [shape: f32[2,1,32], index: 15, kind: input, shape index: {}]   ;;  %s3225_s16 = inlined_call_operand.vmem [shape: f32[2,1,32], index: 16, kind: input, shape index: {}]   ;;  %s3226_s17 = inlined_call_operand.vmem [shape: f32[64,32], index: 17, kind: input, shape index: {}]   ;;  %s3227_s18 = inlined_call_operand.vmem [shape: f32[1,32], index: 18, kind: input, shape index: {}]   ;;  %s3228_s19 = inlined_call_operand.hbm [shape: f32[2,32], index: 19, kind: output, shape index: {}]   ;;  %s3229_s1 = inlined_call_operand.vmem [shape: s32[2], index: 1, kind: input, shape index: {}]  }
   0x1   :  { %3232 = sst [smem:[#allocation11_spill]] %s3210_s0  ;;  %s28_s22 = sshll.u32 %s3229_s1, 4  ;;  %s29_s22 = int_to_ptr.vmem [resolvable:$true] %s28_s22 }
   0x2   :  { %3233 = sst [smem:[#allocation12_spill]] %s3211_s2 }
   0x3   :  { %3234 = sst [smem:[#allocation13_spill]] %s3212_s3 }
   0x4   :  { %3235 = sst [smem:[#allocation14_spill]] %s3213_s4 }
   0x5   :  { %3236 = sst [smem:[#allocation15_spill]] %s3214_s5 }
   0x6   :  { %3237 = sst [smem:[#allocation16_spill]] %s3216_s7 }
   0x7   :  { %3238 = sst [smem:[#allocation17_spill]] %s3220_s11 }
   0x8   :  { %3239 = sst [smem:[#allocation18_spill]] %s3223_s14 }
   0x9   :  { %3240 = sst [smem:[#allocation19_spill]] %s3227_s18 }
   0xa   :  { %3241 = sst [smem:[#allocation20_spill]] %s3228_s19 }
   0xb   :  { %s3242_s20 = sld [smem:[#allocation11_spill]] }
  0x11   :  { %s24_s14 = sshll.u32 %s3242_s20, 4  ;;  %s25_s14 = int_to_ptr.vmem [resolvable:$true] %s24_s14 }
  0x12   :  { %s2741_s3 = scalar_lea.vmem %s25_s14, 16  ;;  %p2746_p1 = scmp.lt.s32.totalorder %s25_s14, %s25_s14 }
  0x13   :  { %p2742_p0 = scmp.ne.s32.totalorder %s25_s14, %s2741_s3  ;;  %p2747_p2 = scmp.lt.s32.totalorder %s2741_s3, %s2741_s3 }
  0x15   :  { %p2748_p3 = por %p2747_p2, %p2746_p1 }
  0x17   :  { %p2749_p4 = pnand %p2748_p3, %p2742_p0 }
  0x19   :  { %2752 = shalt.err (!%p2749_p4)  }
  0x1a   :  { %s2803_s23 = smov [#allocation4]   ;;  %s2753_s24 = scalar_lea.vmem %s29_s22, 16 }
  0x1b   :  { %27 = dma.vmem_to_smem %s25_s14, 16, %s2803_s23, [#allocation3] }
  0x1c   :  { %p2754_p5 = scmp.ne.s32.totalorder %s29_s22, %s2753_s24  ;;  %p2758_p6 = scmp.lt.s32.totalorder %s29_s22, %s29_s22 }
  0x1d   :  { %p2759_p7 = scmp.lt.s32.totalorder %s2753_s24, %s2753_s24 }
  0x1f   :  { %p2760_p8 = por %p2759_p7, %p2758_p6 }
  0x21   :  { %p2761_p9 = pnand %p2760_p8, %p2754_p5 }
  0x23   :  { %2764 = shalt.err (!%p2761_p9)  }
  0x24   :  { %s2804_s25 = smov [#allocation5]  }
  0x25   :  { %31 = dma.vmem_to_smem %s29_s22, 16, %s2804_s25, [#allocation3] }
  0x26   :  { %2793 = dma.done.wait [#allocation3], 32 }
  0x27   :  { %2794 = vsyncadd [#allocation3], 4294967264 }
  0x28   :  { %33 = sfence }
  0x29   :  { %34 = vsyncpa [#allocation7], 0  ;;  %s2922_s1 = smov 0  }
  0x2a LB: > { %3243 = sst [smem:[#allocation10_spill]] %s2801_s1  ;;  %s2928_s14 = sadd.s32 4294967295, %s2801_s1   ;;  %s2801_s1 = sphi %s2922_s1, %s40_s1  }
  0x2b   : > { %p2434_p10 = scmp.ge.s32.totalorder %s2801_s1, 1  ;;  %p589_p11 = scmp.lt.s32.totalorder %s2801_s1, 3 }
  0x2d   : > { %p590_p12 = pnand %p2434_p10, %p589_p11 }
  0x2e   : > { %p675_p13 = scmp.lt.s32.totalorder (!%p590_p12), %s2928_s14, 1  ;;  %s3244_s5 = sld [smem:[#allocation15_spill]] (!%p590_p12) }
  0x2f   : > { %593 = sbr.rel (%p590_p12) target bundleno = 3194 (0xc7a), region = 88  ;;  %s3245_s7 = sld [smem:[#allocation16_spill]] (!%p590_p12) }
  0x30   : > { %s3246_s11 = sld [smem:[#allocation17_spill]] (!%p590_p12)  ;;  %p2443_p0 = scmp.ne.s32.totalorder (!%p590_p12), %s2928_s14, 0 }
  0x31   : > { %s3247_s19 = sld [smem:[#allocation18_spill]] (!%p590_p12) }
  0x34   : > { %s2934_s4 = scalar_select %p675_p13, %s2928_s14, 1 }
  0x35   : > { %s3248_s3 = sld [smem:[#allocation12_spill]] (!%p2443_p0) }
  0x36   : > { %s2490_s26 = sshll.u32 %s2934_s4, 5  ;;  %s2493_s18 = sshll.u32 %s2934_s4, 6 }
  0x37   : > { %s2944_s20 = scalar_lea.vmem %s3244_s5, %s2490_s26  ;;  %s2949_s22 = scalar_lea.vmem %s3245_s7, %s2490_s26 }
  0x38   : > { %s2966_s5 = scalar_lea.vmem %s3246_s11, %s2490_s26  ;;  %s704_s7 = scalar_lea.vmem %s3221_s12, %s2934_s4 }
  0x39   : > { %s2976_s24 = scalar_lea.vmem %s3222_s13, %s2493_s18  ;;  %s712_s27 = scalar_lea.vmem %s3247_s19, %s2934_s4 }
  0x3a   : > { %s715_s0 = scalar_lea.vmem %s3224_s15, %s2934_s4  ;;  %s718_s11 = scalar_lea.vmem %s3225_s16, %s2934_s4 }
  0x3b   : > { %722 = sbr.rel (%p2443_p0) target bundleno = 378 (0x17a), region = 92  ;;  %s3249_s1 = sld [smem:[#allocation13_spill]] (!%p2443_p0) }
  0x3c   : > { %s3250_s26 = sld [smem:[#allocation14_spill]] (!%p2443_p0) }
  0x40   : > { %v723_v0 = vld [vmem:[%s3248_s3] sm:$0xff]  ;;  %vm727_vm0 = vcmask 261120   ;;  %v724_v1 = vld [vmem:[%s3248_s3 + $0x8] sm:$0xff] }
  0x41   : > { %v728_v2 = vsel %vm727_vm0, %v723_v0, 0.0  ;;  %v731_v3 = vsel %vm727_vm0, %v724_v1, 0.0  ;;  %v2444_v21 = vld [vmem:[%s3249_s1] ss:$0 sm:$0xff] }
  0x42   : > { %729 = vadd.xlane.f32.xlu0 %v728_v2  ;;  %v2445_v23 = vld [vmem:[%s3250_s26] ss:$0 sm:$0xff] }
  0x46   : > { %732 = vadd.xlane.f32.xlu0 %v731_v3 }
  0xcb   : > { %v730_v4 = vpop.xlane.xlu0 %729 }
  0xcc   : > { %v735_v5 = vmul.f32 0.03125, %v730_v4 }
  0xce   : > { %v737_v6 = vsub.f32 %v723_v0, %v735_v5 }
  0xcf   : > { %v733_v7 = vpop.xlane.xlu0 %732 }
  0xd0   : > { %v736_v8 = vmul.f32 0.03125, %v733_v7  ;;  %v739_v9 = vmul.f32 %v737_v6, %v737_v6 }
  0xd2   : > { %v738_v10 = vsub.f32 %v724_v1, %v736_v8  ;;  %v741_v11 = vsel %vm727_vm0, %v739_v9, 0.0 }
  0xd3   : > { %742 = vadd.xlane.f32.xlu1 %v741_v11 }
  0xd4   : > { %v740_v12 = vmul.f32 %v738_v10, %v738_v10 }
  0xd6   : > { %v744_v13 = vsel %vm727_vm0, %v740_v12, 0.0 }
  0xd7   : > { %745 = vadd.xlane.f32.xlu1 %v744_v13 }
 0x15c   : > { %v743_v14 = vpop.xlane.xlu1 %742 }
 0x15d   : > { %v747_v15 = vmul.f32 0.03125, %v743_v14 }
 0x15f   : > { %v749_v16 = vadd.f32 1e-12, %v747_v15 }
 0x160   : > { %v746_v17 = vpop.xlane.xlu1 %745 }
 0x161   : > { %2709 = vrsqrt.f32 %v749_v16  ;;  %v748_v18 = vmul.f32 0.03125, %v746_v17 }
 0x163   : > { %v750_v19 = vadd.f32 1e-12, %v748_v18 }
 0x165   : > { %2711 = vrsqrt.f32 %v750_v19 }
 0x16e   : > { %v2710_v20 = vpop.eup %2709 }
 0x16f   : > { %v753_v22 = vmul.f32 %v2710_v20, %v737_v6 }
 0x171   : > { %v761_v24 = vmul.f32 %v2444_v21, %v753_v22 }
 0x172   : > { %v2712_v25 = vpop.eup %2711 }
 0x173   : > { %v769_v26 = vadd.f32 %v2445_v23, %v761_v24  ;;  %v754_v27 = vmul.f32 %v2712_v25, %v738_v10 }
 0x175   : > { %771 = vst.msk [vmem:[#allocation2] sm:$0xff] %vm727_vm0, %v769_v26  ;;  %v762_v28 = vmul.f32 %v2444_v21, %v754_v27 }
 0x177   : > { %v770_v29 = vadd.f32 %v2445_v23, %v762_v28 }
 0x179   : > { %772 = vst.msk [vmem:[#allocation2 + $0x8] sm:$0xff] %vm727_vm0, %v770_v29 }
 0x17a PF: > { %v778_v30 = vld [vmem:[%s2944_s20 + $0x18] sm:$0xff]  ;;  %v777_v31 = vld [vmem:[%s2944_s20 + $0x10] sm:$0xff]  ;;  %vm786_vm1 = vcmask 261120   ;;  %v776_v33 = vld [vmem:[%s2944_s20 + $0x8] sm:$0xff]  ;;  %v2805_v36 = vmov 0.0   ;;  %vm2806_vm2 = vmmov 0   ;;  %s3251_s21 = scalar_lea.vmem %s3215_s6, %s2934_s4  ;;  %s3252_s28 = scalar_lea.vmem %s3217_s8, %s2934_s4 }
 0x17b   : > { %2554 = vmatprep.subr.mxu1 %v778_v30  ;;  %v775_v34 = vld [vmem:[%s2944_s20] sm:$0xff]  ;;  %2575 = vmatprep.subr.mxu0 %v2805_v36  ;;  %s2807_s2 = smov 96   ;;  %s2808_s18 = smov 112   ;;  %vm872_vm3 = vcmask 130048   ;;  %vm948_vm4 = vcmask 64512   ;;  %vm1806_vm5 = vcmask 523264  }
 0x17c   : > { %v3011_v32 = vld [vmem:[#allocation2] sm:$0xff]  ;;  %2555 = vmatpush3.msra.mxu1 %v778_v30  ;;  %2577 = vmatprep.mubr.msk.f32.mxu0 %vm2806_vm2, %v2805_v36  ;;  %s2809_s23 = smov 80   ;;  %s2810_s19 = smov 64  }
 0x17d   : > { %2562 = vmatprep.mubr.msk.f32.mxu1 %vm786_vm1, %v3011_v32  ;;  %2556 = vmatprep.subr.mxu1 %v777_v31  ;;  %v2446_v38 = vld [vmem:[%s3251_s21] ss:$0 sm:$0xff]  ;;  %s2811_s29 = smov 48   ;;  %s2812_s1 = smov 16  }
 0x17e   : > { %2557 = vmatpush3.msra.mxu1 %v777_v31  ;;  %s3253_s30 = scalar_lea.vmem %s3218_s9, %s2934_s4  ;;  %p2474_p1 = scmp.ne.s32.totalorder %s2928_s14, 1 }
 0x17f   : > { %2558 = vmatprep.subr.mxu1 %v776_v33  ;;  %s2479_s25 = sld [smem:[#allocation5 + $0x1]] (!%p2474_p1) }
 0x180   : > { %2559 = vmatpush3.msra.mxu1 %v776_v33  ;;  %v3017_v35 = vld [vmem:[#allocation2 + $0x8] sm:$0xff] }
 0x181   : > { %2560 = vmatprep.subr.mxu1 %v775_v34 }
 0x182   : > { %2561 = vmatpush3.msra.mxu1 %v775_v34 }
 0x183   : > { %2563 = vmatmul.mubr.msk.f32.vlgmr.msra.gmra.mxu1 %vm786_vm1, %v3017_v35  ;;  %2565 = vmatprep.subr.mxu1 %v2805_v36 }
 0x184   : > { %2567 = vmatprep.mubr.msk.f32.mxu1 %vm2806_vm2, %v2805_v36 }
 0x243   : > { %v2564_v37 = vpop.f32.mrf.mxu1 }
 0x244   : > { %v3036_v42 = vadd.f32 %v2564_v37, %v2446_v38  ;;  %v1545_v37 = vld [vmem:[%s2949_s22 + $0x18] sm:$0xff] }
 0x245   : > { %v859_v39 = vpop.f32.mrf.mxu1 }
 0x246   : > { %v3032_v40 = vadd.f32 %v2446_v38, %v859_v39  ;;  %v1206_v43 = vmul.f32 0.25, %v3036_v42  ;;  %v1544_v38 = vld [vmem:[%s2949_s22 + $0x10] sm:$0xff]  ;;  %v1543_v39 = vld [vmem:[%s2949_s22 + $0x8] sm:$0xff] }
 0x248   : > { %870 = vrot.lane.b32.xlu0 %v3032_v40, %s2807_s2  ;;  %v868_v41 = vmul.f32 0.25, %v3032_v40 }
 0x24a   : > { %1036 = vrot.lane.b32.xlu1 %v868_v41, %s2808_s18 }
 0x24c   : > { %1038 = vrot.lane.b32.xlu0 %v3032_v40, %s2809_s23 }
 0x24e   : > { %1208 = vrot.lane.b32.xlu1 %v3036_v42, %s2807_s2  ;;  %s3254_s2 = scalar_lea.vmem %s3219_s10, %s2934_s4  ;;  %s1949_s4 = sld [smem:[#allocation5]] (!%p2474_p1) }
 0x250   : > { %1374 = vrot.lane.b32.xlu0 %v3036_v42, %s2809_s23 }
 0x252   : > { %1372 = vrot.lane.b32.xlu1 %v1206_v43, %s2808_s18 }
 0x2ba   : > { %v871_v44 = vpop.permute.xlu0 %870 }
 0x2bb   : > { %2566 = vmatpush3.xpose.msk.msra.mxu1 %vm872_vm3, %v871_v44 }
 0x2bc   : > { %v1037_v45 = vpop.permute.xlu1 %1036  ;;  %2570 = vmatprep.subr.mxu1 %v2805_v36 }
 0x2be   : > { %v1039_v46 = vpop.permute.xlu0 %1038  ;;  %2568 = vmatmul.mubr.msk.f32.vlgmr.msra.gmra.mxu1 %vm872_vm3, %v868_v41 }
 0x2bf   : > { %2576 = vmatpush3.xpose.msk.msra.mxu0 %vm872_vm3, %v1039_v46  ;;  %2572 = vmatprep.mubr.msk.f32.mxu1 %vm2806_vm2, %v2805_v36 }
 0x2c0   : > { %2585 = vmatprep.subr.mxu0 %v2805_v36  ;;  %v1209_v47 = vpop.permute.xlu1 %1208 }
 0x2c2   : > { %2578 = vmatmul.mubr.msk.f32.vlgmr.msra.gmra.mxu0 %vm872_vm3, %v1037_v45  ;;  %v1375_v48 = vpop.permute.xlu0 %1374 }
 0x2c3   : > { %2586 = vmatpush3.xpose.msk.msra.mxu0 %vm872_vm3, %v1209_v47  ;;  %2587 = vmatprep.mubr.msk.f32.mxu0 %vm2806_vm2, %v2805_v36 }
 0x2c4   : > { %2595 = vmatprep.subr.mxu0 %v2805_v36  ;;  %v1373_v49 = vpop.permute.xlu1 %1372 }
 0x2c6   : > { %2588 = vmatmul.mubr.msk.f32.vlgmr.msra.gmra.mxu0 %vm872_vm3, %v1206_v43 }
 0x2c7   : > { %2596 = vmatpush3.xpose.msk.msra.mxu0 %vm872_vm3, %v1375_v48  ;;  %2597 = vmatprep.mubr.msk.f32.mxu0 %vm2806_vm2, %v2805_v36 }
 0x2c8   : > { %2605 = vmatprep.subr.mxu0 %v1545_v37 }
 0x2ca   : > { %2598 = vmatmul.mubr.msk.f32.vlgmr.msra.gmra.mxu0 %vm872_vm3, %v1373_v49 }
 0x2cb   : > { %2606 = vmatpush3.msra.mxu0 %v1545_v37 }
 0x2cc   : > { %2607 = vmatprep.subr.mxu0 %v1544_v38 }
 0x2cd   : > { %2608 = vmatpush3.msra.mxu0 %v1544_v38 }
 0x2ce   : > { %2609 = vmatprep.subr.mxu0 %v1543_v39 }
 0x2cf   : > { %2610 = vmatpush3.msra.mxu0 %v1543_v39 }
 0x37e   : > { %v944_v50 = vpop.f32.mrf.mxu1 }
 0x37f   : > { %v949_v51 = vsel %vm948_vm4, %v944_v50, -inf }
 0x380   : > { %950 = vmax.xlane.f32.xlu0 %v949_v51  ;;  %v2569_v52 = vpop.f32.mrf.mxu1 }
 0x381   : > { %v2461_v52 = vld [vmem:[%s3252_s28] ss:$0 sm:$0xff] }
 0x382   : > { %v1110_v53 = vpop.f32.mrf.mxu0 }
 0x383   : > { %v1114_v54 = vsel %vm948_vm4, %v1110_v53, -inf }
 0x384   : > { %1115 = vmax.xlane.f32.xlu1 %v1114_v54  ;;  %v2579_v55 = vpop.f32.mrf.mxu0 }
 0x386   : > { %v1281_v56 = vpop.f32.mrf.mxu0 }
 0x387   : > { %v1285_v57 = vsel %vm948_vm4, %v1281_v56, -inf }
 0x388   : > { %v2589_v58 = vpop.f32.mrf.mxu0  ;;  %1286 = vmax.xlane.f32.xlu0 %v1285_v57 }
 0x38a   : > { %v1446_v59 = vpop.f32.mrf.mxu0 }
 0x38b   : > { %v1450_v60 = vsel %vm948_vm4, %v1446_v59, -inf }
 0x38c   : > { %v2599_v61 = vpop.f32.mrf.mxu0  ;;  %1451 = vmax.xlane.f32.xlu0 %v1450_v60 }
 0x395   : > { %960 = vrot.lane.b32.xlu1 %v3032_v40, %s2810_s19 }
 0x409   : > { %v951_v62 = vpop.xlane.xlu0 %950 }
 0x40a   : > { %v952_v63 = vsub.f32 %v944_v50, %v951_v62 }
 0x40c   : > { %v953_v0 = vmul.f32 1.442695, %v952_v63 }
 0x40d   : > { %v1116_v1 = vpop.xlane.xlu1 %1115 }
 0x40e   : > { %2713 = vpow2.f32 %v953_v0  ;;  %v1117_v2 = vsub.f32 %v1110_v53, %v1116_v1 }
 0x410   : > { %v1118_v3 = vmul.f32 1.442695, %v1117_v2 }
 0x411   : > { %v961_v4 = vpop.permute.xlu1 %960  ;;  %v1287_v5 = vpop.xlane.xlu0 %1286 }
 0x412   : > { %2715 = vpow2.f32 %v1118_v3  ;;  %v1288_v6 = vsub.f32 %v1281_v56, %v1287_v5  ;;  %2571 = vmatpush3.msra.mxu1 %v961_v4  ;;  %v1684_v5 = vld [vmem:[%s2966_s5 + $0x18] sm:$0xff] }
 0x413   : > { %2580 = vmatprep.subr.mxu1 %v2805_v36 }
 0x414   : > { %v1289_v7 = vmul.f32 1.442695, %v1288_v6  ;;  %v1683_v6 = vld [vmem:[%s2966_s5 + $0x10] sm:$0xff] }
 0x415   : > { %v1452_v8 = vpop.xlane.xlu0 %1451 }
 0x416   : > { %2717 = vpow2.f32 %v1289_v7  ;;  %v1453_v9 = vsub.f32 %v1446_v59, %v1452_v8  ;;  %v1682_v7 = vld [vmem:[%s2966_s5 + $0x8] sm:$0xff]  ;;  %v1681_v8 = vld [vmem:[%s2966_s5] sm:$0xff] }
 0x418   : > { %v1454_v10 = vmul.f32 1.442695, %v1453_v9 }
 0x41a   : > { %2719 = vpow2.f32 %v1454_v10 }
 0x41b   : > { %v2714_v11 = vpop.eup %2713 }
 0x41c   : > { %v955_v12 = vsel %vm948_vm4, %v2714_v11, 0.0 }
 0x41d   : > { %956 = vadd.xlane.f32.xlu1 %v955_v12 }
 0x41f   : > { %v2716_v13 = vpop.eup %2715 }
 0x420   : > { %v1120_v14 = vsel %vm948_vm4, %v2716_v13, 0.0 }
 0x421   : > { %1121 = vadd.xlane.f32.xlu0 %v1120_v14 }
 0x423   : > { %v2718_v15 = vpop.eup %2717 }
 0x424   : > { %v1291_v16 = vsel %vm948_vm4, %v2718_v15, 0.0 }
 0x425   : > { %1292 = vadd.xlane.f32.xlu1 %v1291_v16  ;;  %v2464_v16 = vld [vmem:[%s3253_s30] ss:$0 sm:$0xff] }
 0x427   : > { %v2720_v17 = vpop.eup %2719 }
 0x428   : > { %v1456_v18 = vsel %vm948_vm4, %v2720_v17, 0.0 }
 0x429   : > { %1457 = vadd.xlane.f32.xlu0 %v1456_v18  ;;  %v2465_v18 = vld [vmem:[%s3254_s2] ss:$0 sm:$0xff] }
 0x436   : > { %1296 = vrot.lane.b32.xlu1 %v3036_v42, %s2810_s19 }
 0x43a   : > { %1461 = vrot.lane.b32.xlu1 %v3036_v42, %s2811_s29 }
 0x43f   : > { %1125 = vrot.lane.b32.xlu0 %v3032_v40, %s2811_s29  ;;  %v1542_v40 = vld [vmem:[%s2949_s22] sm:$0xff] }
 0x440   : > { %2611 = vmatprep.subr.mxu0 %v1542_v40 }
 0x441   : > { %2612 = vmatpush3.msra.mxu0 %v1542_v40 }
 0x4a6   : > { %v957_v19 = vpop.xlane.xlu1 %956 }
 0x4a7   : > { %2721 = vrcp.f32 %v957_v19 }
 0x4aa   : > { %v1122_v20 = vpop.xlane.xlu0 %1121 }
 0x4ab   : > { %2723 = vrcp.f32 %v1122_v20 }
 0x4ae   : > { %v1293_v21 = vpop.xlane.xlu1 %1292 }
 0x4af   : > { %2725 = vrcp.f32 %v1293_v21 }
 0x4b2   : > { %v1458_v22 = vpop.xlane.xlu0 %1457  ;;  %v1297_v27 = vpop.permute.xlu1 %1296 }
 0x4b3   : > { %2727 = vrcp.f32 %v1458_v22 }
 0x4b4   : > { %v2722_v23 = vpop.eup %2721 }
 0x4b5   : > { %v959_v24 = vmul.f32 %v2722_v23, %v2714_v11 }
 0x4b6   : > { %v1126_v25 = vpop.permute.xlu0 %1125  ;;  %v1462_v31 = vpop.permute.xlu1 %1461 }
 0x4b7   : > { %2573 = vmatmul.mubr.msk.f32.vlgmr.msra.gmra.mxu1 %vm948_vm4, %v959_v24 }
 0x4b8   : > { %v2724_v26 = vpop.eup %2723  ;;  %2581 = vmatpush3.msra.mxu1 %v1126_v25  ;;  %2582 = vmatprep.mubr.msk.f32.mxu1 %vm2806_vm2, %v2805_v36  ;;  %v1798_v25 = vld [vmem:[%s2976_s24 + $0x38] sm:$0xff] }
 0x4b9   : > { %2590 = vmatprep.subr.mxu1 %v2805_v36  ;;  %v1124_v28 = vmul.f32 %v2724_v26, %v2716_v13  ;;  %v1797_v26 = vld [vmem:[%s2976_s24 + $0x30] sm:$0xff]  ;;  %2627 = vmatprep.subr.mxu0 %v1798_v25 }
 0x4bb   : > { %2583 = vmatmul.mubr.msk.f32.vlgmr.msra.gmra.mxu1 %vm948_vm4, %v1124_v28  ;;  %v1795_v28 = vld [vmem:[%s2976_s24 + $0x20] sm:$0xff] }
 0x4bc   : > { %v2726_v29 = vpop.eup %2725  ;;  %2591 = vmatpush3.msra.mxu1 %v1297_v27  ;;  %2592 = vmatprep.mubr.msk.f32.mxu1 %vm2806_vm2, %v2805_v36  ;;  %v1796_v27 = vld [vmem:[%s2976_s24 + $0x28] sm:$0xff] }
 0x4bd   : > { %2600 = vmatprep.subr.mxu1 %v2805_v36  ;;  %v1295_v30 = vmul.f32 %v2726_v29, %v2718_v15  ;;  %v1794_v29 = vld [vmem:[%s2976_s24 + $0x18] sm:$0xff] }
 0x4bf   : > { %2593 = vmatmul.mubr.msk.f32.vlgmr.msra.gmra.mxu1 %vm948_vm4, %v1295_v30  ;;  %v1793_v30 = vld [vmem:[%s2976_s24 + $0x10] sm:$0xff] }
 0x4c0   : > { %v2728_v33 = vpop.eup %2727  ;;  %2601 = vmatpush3.msra.mxu1 %v1462_v31  ;;  %2602 = vmatprep.mubr.msk.f32.mxu1 %vm2806_vm2, %v2805_v36  ;;  %v1792_v31 = vld [vmem:[%s2976_s24 + $0x8] sm:$0xff] }
 0x4c1   : > { %v1460_v34 = vmul.f32 %v2728_v33, %v2720_v17  ;;  %2616 = vmatprep.subr.mxu1 %v1684_v5  ;;  %v1791_v33 = vld [vmem:[%s2976_s24] sm:$0xff] }
 0x4c3   : > { %2603 = vmatmul.mubr.msk.f32.vlgmr.msra.gmra.mxu1 %vm948_vm4, %v1460_v34  ;;  %v2466_v34 = vld [vmem:[%s704_s7] ss:$0 sm:$0xff] }
 0x4c4   : > { %2617 = vmatpush3.msra.mxu1 %v1684_v5 }
 0x4c5   : > { %2618 = vmatprep.subr.mxu1 %v1683_v6 }
 0x4c6   : > { %2619 = vmatpush3.msra.mxu1 %v1683_v6 }
 0x4c7   : > { %2620 = vmatprep.subr.mxu1 %v1682_v7 }
 0x4c8   : > { %2621 = vmatpush3.msra.mxu1 %v1682_v7 }
 0x4c9   : > { %2622 = vmatprep.subr.mxu1 %v1681_v8 }
 0x4ca   : > { %2623 = vmatpush3.msra.mxu1 %v1681_v8 }
 0x577   : > { %v1032_v41 = vpop.f32.mrf.mxu1 }
 0x579   : > { %v2574_v42 = vpop.f32.mrf.mxu1 }
 0x57b   : > { %v1197_v43 = vpop.f32.mrf.mxu1 }
 0x57c   : > { %1202 = vrot.lane.b32.xlu0 %v1197_v43, %s2812_s1 }
 0x57d   : > { %v2584_v36 = vpop.f32.mrf.mxu1 }
 0x57f   : > { %v1368_v44 = vpop.f32.mrf.mxu1 }
 0x581   : > { %v2594_v45 = vpop.f32.mrf.mxu1 }
 0x583   : > { %v1533_v46 = vpop.f32.mrf.mxu1 }
 0x584   : > { %1538 = vrot.lane.b32.xlu1 %v1533_v46, %s2812_s1 }
 0x585   : > { %v2604_v47 = vpop.f32.mrf.mxu1 }
 0x5ee   : > { %v1203_v48 = vpop.permute.xlu0 %1202 }
 0x5ef   : > { %v1205_v49 = vsel %vm872_vm3, %v1032_v41, %v1203_v48 }
 0x5f0   : > { %2613 = vmatprep.mubr.msk.f32.mxu0 %vm786_vm1, %v1205_v49 }
 0x5f6   : > { %v1539_v50 = vpop.permute.xlu1 %1538 }
 0x5f7   : > { %v1541_v51 = vsel %vm872_vm3, %v1368_v44, %v1539_v50 }
 0x5f8   : > { %2614 = vmatmul.mubr.msk.f32.vlgmr.msra.gmra.mxu0 %vm786_vm1, %v1541_v51 }
 0x5f9   : > { %2628 = vmatpush3.msra.mxu0 %v1798_v25 }
 0x5fa   : > { %2629 = vmatprep.subr.mxu0 %v1797_v26 }
 0x5fb   : > { %2630 = vmatpush3.msra.mxu0 %v1797_v26 }
 0x5fc   : > { %2631 = vmatprep.subr.mxu0 %v1796_v27 }
 0x5fd   : > { %2632 = vmatpush3.msra.mxu0 %v1796_v27 }
 0x5fe   : > { %2633 = vmatprep.subr.mxu0 %v1795_v28 }
 0x5ff   : > { %2634 = vmatpush3.msra.mxu0 %v1795_v28 }
 0x600   : > { %2635 = vmatprep.subr.mxu0 %v1794_v29 }
 0x601   : > { %2636 = vmatpush3.msra.mxu0 %v1794_v29 }
 0x602   : > { %2637 = vmatprep.subr.mxu0 %v1793_v30 }
 0x603   : > { %2638 = vmatpush3.msra.mxu0 %v1793_v30 }
 0x604   : > { %2639 = vmatprep.subr.mxu0 %v1792_v31 }
 0x605   : > { %2640 = vmatpush3.msra.mxu0 %v1792_v31 }
 0x606   : > { %2641 = vmatprep.subr.mxu0 %v1791_v33 }
 0x607   : > { %2642 = vmatpush3.msra.mxu0 %v1791_v33 }
 0x6b8   : > { %v2615_v53 = vpop.f32.mrf.mxu0 }
 0x6b9   : > { %v1631_v54 = vadd.f32 %v2615_v53, %v2461_v52 }
 0x6ba   : > { %v1625_v55 = vpop.f32.mrf.mxu0 }
 0x6bb   : > { %v1626_v56 = vadd.f32 %v2461_v52, %v1625_v55  ;;  %v1635_v57 = vadd.f32 %v1631_v54, %v3017_v35 }
 0x6bd   : > { %v1641_v58 = vsel %vm786_vm1, %v1635_v57, 0.0  ;;  %v1634_v59 = vadd.f32 %v1626_v56, %v3011_v32 }
 0x6be   : > { %1642 = vadd.xlane.f32.xlu1 %v1641_v58  ;;  %v2469_v58 = vld [vmem:[%s712_s27] ss:$0 sm:$0xff] }
 0x6bf   : > { %v1638_v60 = vsel %vm786_vm1, %v1634_v59, 0.0 }
 0x6c0   : > { %1639 = vadd.xlane.f32.xlu0 %v1638_v60 }
 0x747   : > { %v1643_v61 = vpop.xlane.xlu1 %1642 }
 0x748   : > { %v1646_v62 = vmul.f32 0.03125, %v1643_v61 }
 0x749   : > { %v1640_v63 = vpop.xlane.xlu0 %1639 }
 0x74a   : > { %v1645_v0 = vmul.f32 0.03125, %v1640_v63  ;;  %v1648_v1 = vsub.f32 %v1635_v57, %v1646_v62 }
 0x74c   : > { %v1647_v2 = vsub.f32 %v1634_v59, %v1645_v0  ;;  %v1650_v4 = vmul.f32 %v1648_v1, %v1648_v1 }
 0x74e   : > { %v1649_v3 = vmul.f32 %v1647_v2, %v1647_v2  ;;  %v1654_v32 = vsel %vm786_vm1, %v1650_v4, 0.0 }
 0x750   : > { %v1651_v35 = vsel %vm786_vm1, %v1649_v3, 0.0 }
 0x751   : > { %1652 = vadd.xlane.f32.xlu0 %v1651_v35 }
 0x755   : > { %1655 = vadd.xlane.f32.xlu0 %v1654_v32 }
 0x7da   : > { %v1653_v9 = vpop.xlane.xlu0 %1652 }
 0x7db   : > { %v1657_v10 = vmul.f32 0.03125, %v1653_v9 }
 0x7dd   : > { %v1659_v11 = vadd.f32 1e-12, %v1657_v10 }
 0x7de   : > { %v1656_v12 = vpop.xlane.xlu0 %1655 }
 0x7df   : > { %2729 = vrsqrt.f32 %v1659_v11  ;;  %v1658_v13 = vmul.f32 0.03125, %v1656_v12 }
 0x7e1   : > { %v1660_v14 = vadd.f32 1e-12, %v1658_v13 }
 0x7e3   : > { %2731 = vrsqrt.f32 %v1660_v14 }
 0x7ec   : > { %v2730_v15 = vpop.eup %2729 }
 0x7ed   : > { %v1663_v17 = vmul.f32 %v2730_v15, %v1647_v2 }
 0x7ef   : > { %v1671_v19 = vmul.f32 %v2464_v16, %v1663_v17 }
 0x7f0   : > { %v2732_v20 = vpop.eup %2731 }
 0x7f1   : > { %v1664_v21 = vmul.f32 %v2732_v20, %v1648_v1  ;;  %v3119_v22 = vadd.f32 %v2465_v18, %v1671_v19 }
 0x7f3   : > { %v1672_v23 = vmul.f32 %v2464_v16, %v1664_v21  ;;  %2624 = vmatprep.mubr.msk.f32.mxu1 %vm786_vm1, %v3119_v22  ;;  %v2473_v21 = vld [vmem:[%s718_s11] ss:$0 sm:$0xff]  ;;  %s2477_s11 = sld [smem:[#allocation4 + $0x1]] (!%p2474_p1) }
 0x7f5   : > { %v1680_v24 = vadd.f32 %v2465_v18, %v1672_v23  ;;  %v2472_v18 = vld [vmem:[%s715_s0] ss:$0 sm:$0xff]  ;;  %s1944_s0 = sld [smem:[#allocation4]] (!%p2474_p1) }
 0x7f7   : > { %2625 = vmatmul.mubr.msk.f32.vlgmr.msra.gmra.mxu1 %vm786_vm1, %v1680_v24 }
 0x8b7   : > { %v2626_v37 = vpop.f32.mrf.mxu1 }
 0x8b8   : > { %v1770_v38 = vadd.f32 %v2626_v37, %v2466_v34 }
 0x8b9   : > { %v1764_v39 = vpop.f32.mrf.mxu1 }
 0x8ba   : > { %v1776_v40 = vmul.f32 0.044715, %v1770_v38  ;;  %v1765_v41 = vadd.f32 %v2466_v34, %v1764_v39  ;;  %v1774_v55 = vmul.f32 0.5, %v1770_v38 }
 0x8bc   : > { %v1778_v42 = vmul.f32 %v1776_v40, %v1770_v38  ;;  %v1775_v43 = vmul.f32 0.044715, %v1765_v41  ;;  %v1773_v53 = vmul.f32 0.5, %v1765_v41 }
 0x8be   : > { %v1780_v36 = vmul.f32 %v1778_v42, %v1770_v38  ;;  %v1777_v44 = vmul.f32 %v1775_v43, %v1765_v41 }
 0x8c0   : > { %v1782_v45 = vadd.f32 %v1780_v36, %v1770_v38  ;;  %v1779_v46 = vmul.f32 %v1777_v44, %v1765_v41 }
 0x8c2   : > { %v1784_v47 = vmul.f32 0.7978846, %v1782_v45  ;;  %v1781_v48 = vadd.f32 %v1779_v46, %v1765_v41 }
 0x8c4   : > { %2733 = vtanh.f32 %v1784_v47  ;;  %v1783_v49 = vmul.f32 0.7978846, %v1781_v48 }
 0x8c6   : > { %2735 = vtanh.f32 %v1783_v49 }
 0x8d1   : > { %v2734_v50 = vpop.eup %2733 }
 0x8d2   : > { %v1788_v52 = vadd.f32 1.0, %v2734_v50 }
 0x8d3   : > { %v2736_v51 = vpop.eup %2735 }
 0x8d4   : > { %v1787_v54 = vadd.f32 1.0, %v2736_v51  ;;  %v1790_v57 = vmul.f32 %v1788_v52, %v1774_v55 }
 0x8d6   : > { %v1789_v56 = vmul.f32 %v1787_v54, %v1773_v53 }
 0x8d8   : > { %2643 = vmatprep.mubr.msk.f32.mxu0 %vm1806_vm5, %v1789_v56 }
 0x8d9   : > { %2644 = vmatmul.mubr.msk.f32.vlgmr.msra.gmra.mxu0 %vm1806_vm5, %v1790_v57 }
 0x999   : > { %v2645_v59 = vpop.f32.mrf.mxu0 }
 0x99a   : > { %v1885_v60 = vadd.f32 %v2645_v59, %v2469_v58 }
 0x99b   : > { %v1879_v61 = vpop.f32.mrf.mxu0 }
 0x99c   : > { %v1880_v62 = vadd.f32 %v2469_v58, %v1879_v61  ;;  %v1889_v63 = vadd.f32 %v1885_v60, %v1680_v24 }
 0x99e   : > { %v1895_v0 = vsel %vm786_vm1, %v1889_v63, 0.0  ;;  %v1888_v1 = vadd.f32 %v1880_v62, %v3119_v22 }
 0x99f   : > { %1896 = vadd.xlane.f32.xlu0 %v1895_v0 }
 0x9a0   : > { %v1892_v2 = vsel %vm786_vm1, %v1888_v1, 0.0 }
 0x9a1   : > { %1893 = vadd.xlane.f32.xlu1 %v1892_v2 }
 0xa28   : > { %v1897_v3 = vpop.xlane.xlu0 %1896 }
 0xa29   : > { %v1899_v35 = vmul.f32 0.03125, %v1897_v3 }
 0xa2a   : > { %v1894_v4 = vpop.xlane.xlu1 %1893 }
 0xa2b   : > { %v1901_v32 = vsub.f32 %v1889_v63, %v1899_v35  ;;  %v1898_v5 = vmul.f32 0.03125, %v1894_v4 }
 0xa2d   : > { %v1900_v6 = vsub.f32 %v1888_v1, %v1898_v5  ;;  %v1903_v7 = vmul.f32 %v1901_v32, %v1901_v32 }
 0xa2f   : > { %v1907_v8 = vsel %vm786_vm1, %v1903_v7, 0.0  ;;  %v1902_v9 = vmul.f32 %v1900_v6, %v1900_v6 }
 0xa30   : > { %1908 = vadd.xlane.f32.xlu0 %v1907_v8 }
 0xa31   : > { %v1904_v10 = vsel %vm786_vm1, %v1902_v9, 0.0 }
 0xa32   : > { %1905 = vadd.xlane.f32.xlu1 %v1904_v10 }
 0xab9   : > { %v1909_v11 = vpop.xlane.xlu0 %1908 }
 0xaba   : > { %v1911_v12 = vmul.f32 0.03125, %v1909_v11 }
 0xabb   : > { %v1906_v13 = vpop.xlane.xlu1 %1905 }
 0xabc   : > { %v1913_v14 = vadd.f32 1e-12, %v1911_v12  ;;  %v1910_v15 = vmul.f32 0.03125, %v1906_v13 }
 0xabe   : > { %2737 = vrsqrt.f32 %v1913_v14  ;;  %v1912_v16 = vadd.f32 1e-12, %v1910_v15 }
 0xac0   : > { %2739 = vrsqrt.f32 %v1912_v16 }
 0xacb   : > { %v2738_v17 = vpop.eup %2737 }
 0xacc   : > { %v1917_v19 = vmul.f32 %v2738_v17, %v1901_v32 }
 0xacd   : > { %v2740_v20 = vpop.eup %2739 }
 0xace   : > { %v1925_v22 = vmul.f32 %v2472_v18, %v1917_v19  ;;  %v1916_v23 = vmul.f32 %v2740_v20, %v1900_v6 }
 0xad0   : > { %v1933_v24 = vadd.f32 %v2473_v21, %v1925_v22  ;;  %v1924_v25 = vmul.f32 %v2472_v18, %v1916_v23  ;;  %1939 = sbr.rel (%p2474_p1) target bundleno = 3173 (0xc65), region = 96 }
 0xad2   : > { %1935 = vst.msk [vmem:[#allocation2 + $0x8] sm:$0xff] %vm786_vm1, %v1933_v24  ;;  %v1932_v26 = vadd.f32 %v2473_v21, %v1924_v25 }
 0xad4   : > { %1934 = vst.msk [vmem:[#allocation2] sm:$0xff] %vm786_vm1, %v1932_v26 }
 0xad5   : > { %v1942_v28 = vlaneseq  ;;  %v2813_v29 = vmov 0.0   ;;  %vm2814_vm6 = vmmov 0   ;;  %v1945_v33 = vstv %s1944_s0  ;;  %v2120_v41 = vld [vmem:[%s3226_s17 + $0x38] sm:$0xff]  ;;  %v2119_v45 = vld [vmem:[%s3226_s17 + $0x30] sm:$0xff]  ;;  %v2118_v48 = vld [vmem:[%s3226_s17 + $0x28] sm:$0xff] }
 0xad6   : > { %2646 = vmatprep.subr.mxu0 %v2813_v29  ;;  %2653 = vmatprep.subr.mxu1 %v2813_v29  ;;  %v1955_v34 = vstv %s2477_s11  ;;  %vm1964_vm8 = vcmask 1040384   ;;  %v1950_v38 = vstv %s1949_s4  ;;  %v1960_v40 = vstv %s2479_s25  ;;  %v2116_v44 = vld [vmem:[%s3226_s17 + $0x18] sm:$0xff]  ;;  %s3256_s4 = sld [smem:[#allocation19_spill]] }
 0xad7   : > { %v1943_v31 = vand.u32 127, %v1942_v28  ;;  %2650 = vmatprep.mubr.msk.f32.mxu0 %vm2814_vm6, %v2813_v29  ;;  %2657 = vmatprep.mubr.msk.f32.mxu1 %vm2814_vm6, %v2813_v29  ;;  %v2115_v47 = vld [vmem:[%s3226_s17 + $0x10] sm:$0xff]  ;;  %v2114_v49 = vld [vmem:[%s3226_s17 + $0x8] sm:$0xff]  ;;  %v2117_v50 = vld [vmem:[%s3226_s17 + $0x20] sm:$0xff]  ;;  %vm2275_vm12 = vcmask 254976  }
 0xad8   : > { %v2113_v51 = vld [vmem:[%s3226_s17] sm:$0xff] }
 0xad9   : > { %v1941_v27 = vld [vmem:[#allocation2 + $0x8] sm:$0xff]  ;;  %vm1946_vm7 = vcmp.eq.s32.totalorder %v1943_v31, %v1945_v33  ;;  %vm1956_vm9 = vcmp.eq.s32.totalorder %v1943_v31, %v1955_v34  ;;  %vm1951_vm10 = vcmp.eq.s32.totalorder %v1943_v31, %v1950_v38  ;;  %vm1961_vm11 = vcmp.eq.s32.totalorder %v1943_v31, %v1960_v40 }
 0xada   : > { %2647 = vmatpush3.msra.mxu0 %v1941_v27  ;;  %2654 = vmatpush3.msra.mxu1 %v1941_v27  ;;  %v2475_v37 = vsel %vm1946_vm7, 1.0, %v2813_v29  ;;  %v2478_v39 = vsel %vm1956_vm9, 1.0, %v2813_v29  ;;  %v2476_v43 = vsel %vm1951_vm10, 1.0, %v2813_v29  ;;  %v2480_v36 = vsel %vm1961_vm11, 1.0, %v2813_v29 }
 0xadb   : > { %v1940_v30 = vld [vmem:[#allocation2] sm:$0xff]  ;;  %2648 = vmatprep.subr.mxu0 %v2813_v29  ;;  %2655 = vmatprep.subr.mxu1 %v2813_v29  ;;  %v1965_v42 = vsel %vm1964_vm8, %v2475_v37, %v2478_v39  ;;  %v1966_v46 = vsel %vm1964_vm8, %v2476_v43, %v2480_v36 }
 0xadc   : > { %2649 = vmatpush3.msra.mxu0 %v1940_v30  ;;  %2656 = vmatpush3.msra.mxu1 %v1940_v30  ;;  %v2485_v58 = vld [vmem:[%s3256_s4] ss:$0 sm:$0xff] }
 0xadd   : > { %2660 = vmatprep.subr.mxu0 %v2813_v29  ;;  %2671 = vmatprep.subr.mxu1 %v2813_v29 }
 0xade   : > { %2651 = vmatmul.mubr.msk.f32.vlgmr.msra.gmra.mxu0 %vm872_vm3, %v1965_v42  ;;  %2658 = vmatmul.mubr.msk.f32.vlgmr.msra.gmra.mxu1 %vm872_vm3, %v1966_v46 }
 0xadf   : > { %2661 = vmatpush3.msra.mxu0 %v2120_v41  ;;  %2668 = vmatprep.mubr.msk.f32.mxu0 %vm2814_vm6, %v2813_v29 }
 0xae0   : > { %2662 = vmatprep.subr.mxu0 %v2813_v29  ;;  %2672 = vmatpush3.msra.mxu1 %v2116_v44 }
 0xae1   : > { %2663 = vmatpush3.msra.mxu0 %v2119_v45  ;;  %2673 = vmatprep.subr.mxu1 %v2813_v29 }
 0xae2   : > { %2664 = vmatprep.subr.mxu0 %v2813_v29  ;;  %2674 = vmatpush3.msra.mxu1 %v2115_v47 }
 0xae3   : > { %2665 = vmatpush3.msra.mxu0 %v2118_v48  ;;  %2675 = vmatprep.subr.mxu1 %v2813_v29 }
 0xae4   : > { %2666 = vmatprep.subr.mxu0 %v2813_v29  ;;  %2676 = vmatpush3.msra.mxu1 %v2114_v49 }
 0xae5   : > { %2679 = vmatprep.mubr.msk.f32.mxu1 %vm2814_vm6, %v2813_v29  ;;  %2677 = vmatprep.subr.mxu1 %v2813_v29 }
 0xae6   : > { %2667 = vmatpush3.msra.mxu0 %v2117_v50  ;;  %2678 = vmatpush3.msra.mxu1 %v2113_v51 }
 0xb9e   : > { %v2036_v52 = vpop.f32.mrf.mxu0  ;;  %v2109_v53 = vpop.f32.mrf.mxu1 }
 0xb9f   : > { %2680 = vmatmul.mubr.msk.f32.vlgmr.msra.gmra.mxu1 %vm786_vm1, %v2036_v52  ;;  %2669 = vmatmul.mubr.msk.f32.vlgmr.msra.gmra.mxu0 %vm786_vm1, %v2109_v53 }
 0xba0   : > { %v2652_v54 = vpop.f32.mrf.mxu0  ;;  %v2659_v55 = vpop.f32.mrf.mxu1 }
 0xc5f   : > { %v2263_v56 = vpop.f32.mrf.mxu1  ;;  %v2190_v57 = vpop.f32.mrf.mxu0 }
 0xc60   : > { %v2264_v60 = vadd.f32 %v2263_v56, %v2190_v57 }
 0xc61   : > { %v2681_v59 = vpop.f32.mrf.mxu1  ;;  %v2670_v61 = vpop.f32.mrf.mxu0 }
 0xc62   : > { %v2274_v62 = vadd.f32 %v2485_v58, %v2264_v60 }
 0xc64   : > { %2276 = vst.msk [vmem:[#allocation6] sm:$0x3] %vm2275_vm12, %v2274_v62 }
 0xc65 PF: > { %p2686_p2 = scmp.eq.s32.totalorder %s2928_s14, 1  ;;  %s2815_s25 = smov [#allocation6]  }
 0xc66   : > { %s2284_s28 = sshll.u32 %s2815_s25, 4  ;;  %s2285_s28 = int_to_ptr.vmem [resolvable:$true] %s2284_s28 }
 0xc67   : > { %s2765_s26 = scalar_lea.vmem %s2285_s28, 32  ;;  %p2772_p6 = scmp.lt.s32.totalorder %s2285_s28, %s2285_s28 }
 0xc68   : > { %p2766_p3 = scmp.ne.s32.totalorder %s2285_s28, %s2765_s26  ;;  %p2773_p7 = scmp.lt.s32.totalorder %s2765_s26, %s2765_s26 }
 0xc6a   : > { %p2767_p4 = pnand %p2766_p3, %p2686_p2  ;;  %p2774_p8 = por %p2773_p7, %p2772_p6 }
 0xc6c   : > { %p2768_p5 = pneg %p2767_p4 }
 0xc6e   : > { %p2775_p9 = pnand %p2774_p8, %p2768_p5 }
 0xc70   : > { %2778 = shalt.err (!%p2775_p9)
}
 0xc71   : > { %s3257_s5 = sld [smem:[#allocation20_spill]] }
 0xc77   : > { %2683 = dma.vmem_to_hbm [thread:$0]  (%p2686_p2), %s2285_s28, 32, %s3257_s5, [#allocation7]  }
 0xc78   : > { %2796 = dma.done.wait (%p2686_p2), [#allocation7], 32  }
 0xc79   : > { %2798 = vsyncadd (%p2686_p2), [#allocation7], 4294967264 }
 0xc7a PF: > { %s3258_s21 = sld [smem:[#allocation10_spill]] }
 0xc80   : > { %s40_s1 = sadd.s32 1, %s3258_s21  }
 0xc81   : > { %p37_p10 = scmp.ge.s32.totalorder %s40_s1, 4  }
 0xc83   :  { %39 = sbr.rel (!%p37_p10) target bundleno = 42 (0x2a), region = 156 }
 0xc88   :  { %2297 = vsyncpa [#allocation7], 1 }
 0xc89   :  { %2299 = vsyncpa [#allocation7 + $0x1], 1 }

</bundles_post_ra>
